<compile_context>
chip_gen: v6e
topology: v6e:2x2x1
jax: 0.10.0
libtpu: 0.0.40
codegen_flags: <defaults>
</compile_context>

<pallas_src>
import functools

import jax
import jax.numpy as jnp
from jax import lax
from jax.experimental import pallas as pl
from jax.experimental.pallas import tpu as pltpu

EPS = 1e-5


def _vmem_limit_bytes():
    # v5e/v6e: 128 MiB physical VMEM, v7x: 64 MiB.  Use ~75% of capacity;
    # fall back to the compiler default if the query is unavailable.
    try:
        return int(pltpu.get_tpu_info().vmem_capacity_bytes) * 3 // 4
    except Exception:
        return None


_VMEM_LIMIT = _vmem_limit_bytes()


# ----------------------------------------------------------------------------
# Kernel A: 3x3 conv1 over the flattened padded image + channel stats.
# One grid step per image; 9 MXU dots of (Cout, Cin) @ (Cin, H*Wp), spatial on
# lanes.  The output is stored already zero-padded (halo folded in).
# ----------------------------------------------------------------------------
def _conv1_stats_kernel(x_ref, w_ref, vmask_ref, h_ref, st_ref, *, H, Wp, Cout, L):
    # x_ref : (1, Cin, L)    bf16  flattened zero-padded input image
    # w_ref : (9, Cout, Cin) bf16  per-tap weight matrices (tap k = ky*3+kx)
    # vmask_ref: (1, H*Wp)   f32   1.0 on real output columns, 0.0 on wrap cols
    # h_ref : (1, Cout, L)   bf16  conv1 output with zero halo folded in
    # st_ref: (1, Cout, 2)   f32   per-image [sum, sum_of_squares] per channel
    HWp = H * Wp
    acc = jnp.zeros((Cout, HWp), jnp.float32)
    for ky in range(3):
        for kx in range(3):
            slab = x_ref[0, :, pl.ds(ky * Wp + kx, HWp)]      # contiguous slab
            acc = acc + jnp.dot(w_ref[ky * 3 + kx], slab,
                                preferred_element_type=jnp.float32)
    acc = acc * vmask_ref[...]                                # zero wrap columns
    st_ref[0, :, 0:1] = jnp.sum(acc, axis=1, keepdims=True)
    st_ref[0, :, 1:2] = jnp.sum(acc * acc, axis=1, keepdims=True)
    # Fold the 1-pixel halo into the output: valid pixel (i, j) lands at flat
    # padded position (Wp+1) + (i*Wp + j); masked wrap columns land exactly on
    # the left/right zero-padding positions.  Border strips are zeroed here.
    h_ref[0, :, pl.ds(0, Wp + 1)] = jnp.zeros((Cout, Wp + 1), h_ref.dtype)
    h_ref[0, :, pl.ds(Wp + 1, HWp)] = acc.astype(h_ref.dtype)
    tail = L - (Wp + 1) - HWp
    h_ref[0, :, pl.ds(Wp + 1 + HWp, tail)] = jnp.zeros((Cout, tail), h_ref.dtype)


def _conv1_call(xpad, w1t, vmask, *, N, H, Wp, Cin, Cout, L):
    HWp = H * Wp
    kernel = functools.partial(_conv1_stats_kernel, H=H, Wp=Wp, Cout=Cout, L=L)
    return pl.pallas_call(
        kernel,
        out_shape=(jax.ShapeDtypeStruct((N, Cout, L), jnp.bfloat16),
                   jax.ShapeDtypeStruct((N, Cout, 2), jnp.float32)),
        grid=(N,),
        in_specs=[
            pl.BlockSpec((1, Cin, L), lambda n: (n, 0, 0)),
            pl.BlockSpec((9, Cout, Cin), lambda n: (0, 0, 0)),
            pl.BlockSpec((1, HWp), lambda n: (0, 0)),
        ],
        out_specs=(
            pl.BlockSpec((1, Cout, L), lambda n: (n, 0, 0)),
            pl.BlockSpec((1, Cout, 2), lambda n: (n, 0, 0)),
        ),
        compiler_params=pltpu.CompilerParams(
            dimension_semantics=("parallel",),
            vmem_limit_bytes=_VMEM_LIMIT),
    )(xpad, w1t, vmask)


# ----------------------------------------------------------------------------
# Kernel B: BN1 + ReLU prologue (f32 elementwise), 3x3 conv2 + channel stats.
# The halo positions are re-zeroed with a tiny (1, L) interior mask (BN shift
# is non-zero on the border), then 9 slab dots as in kernel A.
# ----------------------------------------------------------------------------
def _bnrelu_conv2_stats_kernel(h_ref, sc_ref, sh_ref, w_ref, imask_ref,
                               vmask_ref, o_ref, st_ref, *, H, Wp, Cout):
    # h_ref : (1, Cout, L)   bf16  conv1 output incl. zero halo
    # sc_ref/sh_ref: (Cout, 1) f32 BN1 scale / shift
    # w_ref : (9, Cout, Cout) bf16
    # imask_ref: (1, L) f32  1.0 on interior pixels, 0.0 on halo/ghost positions
    # vmask_ref: (1, H*Wp) f32
    # o_ref : (1, Cout, H*Wp) bf16 ; st_ref: (1, Cout, 2) f32
    HWp = H * Wp
    y = jnp.maximum(h_ref[0].astype(jnp.float32) * sc_ref[...] + sh_ref[...], 0.0)
    y = (y * imask_ref[...]).astype(jnp.bfloat16)      # re-zero padding positions
    acc = jnp.zeros((Cout, HWp), jnp.float32)
    for ky in range(3):
        for kx in range(3):
            off = ky * Wp + kx
            acc = acc + jnp.dot(w_ref[ky * 3 + kx], y[:, off:off + HWp],
                                preferred_element_type=jnp.float32)
    acc = acc * vmask_ref[...]
    st_ref[0, :, 0:1] = jnp.sum(acc, axis=1, keepdims=True)
    st_ref[0, :, 1:2] = jnp.sum(acc * acc, axis=1, keepdims=True)
    o_ref[0, :, :] = acc.astype(o_ref.dtype)


def _conv2_call(h1pad, sc1, sh1, w2t, imask, vmask, *, N, H, Wp, Cout, L):
    HWp = H * Wp
    kernel = functools.partial(_bnrelu_conv2_stats_kernel, H=H, Wp=Wp, Cout=Cout)
    return pl.pallas_call(
        kernel,
        out_shape=(jax.ShapeDtypeStruct((N, Cout, HWp), jnp.bfloat16),
                   jax.ShapeDtypeStruct((N, Cout, 2), jnp.float32)),
        grid=(N,),
        in_specs=[
            pl.BlockSpec((1, Cout, L), lambda n: (n, 0, 0)),
            pl.BlockSpec((Cout, 1), lambda n: (0, 0)),
            pl.BlockSpec((Cout, 1), lambda n: (0, 0)),
            pl.BlockSpec((9, Cout, Cout), lambda n: (0, 0, 0)),
            pl.BlockSpec((1, L), lambda n: (0, 0)),
            pl.BlockSpec((1, HWp), lambda n: (0, 0)),
        ],
        out_specs=(
            pl.BlockSpec((1, Cout, HWp), lambda n: (n, 0, 0)),
            pl.BlockSpec((1, Cout, 2), lambda n: (n, 0, 0)),
        ),
        compiler_params=pltpu.CompilerParams(
            dimension_semantics=("parallel",),
            vmem_limit_bytes=_VMEM_LIMIT),
    )(h1pad, sc1, sh1, w2t, imask, vmask)


# ----------------------------------------------------------------------------
# Kernel C: BN2 + ReLU epilogue, dropping the 2 wrap columns per image row and
# writing a lane-dense (Cout, H*W) slab per image.
# ----------------------------------------------------------------------------
def _bnrelu_out_kernel(h_ref, sc_ref, sh_ref, o_ref, *, H, W, Wp):
    # h_ref : (1, Cout, H*Wp) bf16 ; o_ref : (1, Cout, H*W) f32
    y = jnp.maximum(h_ref[0].astype(jnp.float32) * sc_ref[...] + sh_ref[...], 0.0)
    for i in range(H):
        o_ref[0, :, pl.ds(i * W, W)] = y[:, i * Wp:i * Wp + W].astype(o_ref.dtype)


def _bnrelu_out_call(h2, sc2, sh2, *, N, H, W, Wp, Cout):
    HWp = H * Wp
    kernel = functools.partial(_bnrelu_out_kernel, H=H, W=W, Wp=Wp)
    return pl.pallas_call(
        kernel,
        out_shape=jax.ShapeDtypeStruct((N, Cout, H * W), jnp.float32),
        grid=(N,),
        in_specs=[
            pl.BlockSpec((1, Cout, HWp), lambda n: (n, 0, 0)),
            pl.BlockSpec((Cout, 1), lambda n: (0, 0)),
            pl.BlockSpec((Cout, 1), lambda n: (0, 0)),
        ],
        out_specs=pl.BlockSpec((1, Cout, H * W), lambda n: (n, 0, 0)),
        compiler_params=pltpu.CompilerParams(
            dimension_semantics=("parallel",),
            vmem_limit_bytes=_VMEM_LIMIT),
    )(h2, sc2, sh2)


# ----------------------------------------------------------------------------
# Tiny XLA glue: per-channel BN affine from fused (sum, sumsq) stats (f32,
# training-mode biased variance, PyTorch semantics).
# ----------------------------------------------------------------------------
def _affine_from_stats(stats, gamma, beta, count, eps=EPS):
    s = jnp.sum(stats[:, :, 0], axis=0)
    sq = jnp.sum(stats[:, :, 1], axis=0)
    mean = s / count
    var = jnp.maximum(sq / count - mean * mean, 0.0)
    scale = gamma.astype(jnp.float32) * lax.rsqrt(var + eps)
    shift = beta.astype(jnp.float32) - mean * scale
    return scale.reshape(-1, 1), shift.reshape(-1, 1)   # (Cout, 1) f32 each


# ----------------------------------------------------------------------------
# DoubleConv forward (NCHW in / NCHW out, like the PyTorch module).
# ----------------------------------------------------------------------------
def double_conv_forward(x_nchw, w1_oihw, w2_oihw, g1, b1, g2, b2, eps=EPS):
    N, Cin, H, W = x_nchw.shape
    Cout = w1_oihw.shape[0]
    Wp = W + 2
    HWp = H * Wp
    # Flat padded length: rows [1-pad, H data, 2-pad] so the last tap's slab
    # (offset 2*Wp+2, length H*Wp) stays in bounds; extra reads are masked.
    L = (H + 3) * Wp

    # One-time operand prep (bf16 MXU operands; NCHW is already channel-major).
    w1t = jnp.transpose(w1_oihw, (2, 3, 0, 1)).reshape(9, Cout, Cin).astype(jnp.bfloat16)
    w2t = jnp.transpose(w2_oihw, (2, 3, 0, 1)).reshape(9, Cout, Cout).astype(jnp.bfloat16)

    xpad = jnp.pad(x_nchw.astype(jnp.float32), ((0, 0), (0, 0), (1, 2), (1, 1)))
    xpad = xpad.reshape(N, Cin, L).astype(jnp.bfloat16)

    # Tiny lane masks (precomputed once; (1, lanes) vectors, broadcast in-kernel).
    lane = jnp.arange(HWp, dtype=jnp.int32)
    valid_mask = ((lane % Wp) < W).astype(jnp.float32).reshape(1, HWp)
    fl = jnp.arange(L, dtype=jnp.int32)
    r, c = fl // Wp, fl % Wp
    interior_mask = ((r >= 1) & (r <= H) & (c >= 1) & (c <= W)
                     ).astype(jnp.float32).reshape(1, L)

    h1pad, st1 = _conv1_call(xpad, w1t, valid_mask,
                             N=N, H=H, Wp=Wp, Cin=Cin, Cout=Cout, L=L)
    sc1, sh1 = _affine_from_stats(st1, g1, b1, N * H * W, eps)

    h2, st2 = _conv2_call(h1pad, sc1, sh1, w2t, interior_mask, valid_mask,
                          N=N, H=H, Wp=Wp, Cout=Cout, L=L)
    sc2, sh2 = _affine_from_stats(st2, g2, b2, N * H * W, eps)

    out_flat = _bnrelu_out_call(h2, sc2, sh2, N=N, H=H, W=W, Wp=Wp, Cout=Cout)
    return out_flat.reshape(N, Cout, H, W)   # free bitcast reshape, no data pass


# ----------------------------------------------------------------------------
# Pure-JAX reference (mirrors PyTorch training-mode forward, f32).
# ----------------------------------------------------------------------------
def double_conv_reference(x, w1, w2, g1, b1, g2, b2, eps=EPS):
    def conv(x, w):
        return lax.conv_general_dilated(
            x, w, window_strides=(1, 1), padding=((1, 1), (1, 1)),
            dimension_numbers=("NCHW", "OIHW", "NCHW"))

    def bn_relu(y, g, b):
        mean = jnp.mean(y, axis=(0, 2, 3), keepdims=True)
        var = jnp.var(y, axis=(0, 2, 3), keepdims=True)
        yn = (y - mean) / jnp.sqrt(var + eps)
        yn = yn * g.reshape(1, -1, 1, 1) + b.reshape(1, -1, 1, 1)
        return jnp.maximum(yn, 0.0)

    return bn_relu(conv(bn_relu(conv(x, w1), g1, b1), w2), g2, b2)


if __name__ == "__main__":
    N, Cin, Cout, H, W = 2, 4, 8, 16, 16

    key = jax.random.PRNGKey(0)
    kx, kw1, kw2 = jax.random.split(key, 3)
    x = jax.random.normal(kx, (N, Cin, H, W), dtype=jnp.float32)
    # PyTorch-shaped weights (Cout, Cin, 3, 3), bias=False per the module.
    w1 = jax.random.normal(kw1, (Cout, Cin, 3, 3), dtype=jnp.float32) * 0.1
    w2 = jax.random.normal(kw2, (Cout, Cout, 3, 3), dtype=jnp.float32) * 0.1
    # BatchNorm default init: gamma=1, beta=0.
    g1 = jnp.ones((Cout,), jnp.float32)
    b1 = jnp.zeros((Cout,), jnp.float32)
    g2 = jnp.ones((Cout,), jnp.float32)
    b2 = jnp.zeros((Cout,), jnp.float32)

    fwd = jax.jit(double_conv_forward)
    out = jax.block_until_ready(fwd(x, w1, w2, g1, b1, g2, b2))

    ref = double_conv_reference(x, w1, w2, g1, b1, g2, b2)
    assert out.shape == (N, Cout, H, W)
    err = float(jnp.max(jnp.abs(out - ref)))
    # bf16 MXU operands / bf16 inter-kernel activations -> loosened tolerance.
    assert err < 5e-2, err

    print("KERNEL_OK")
</pallas_src>

<mosaic_0001>
module attributes {stable_mosaic.version = 11 : i64} {
  func.func @_conv1_stats_kernel(%arg0: i32, %arg1: memref<1x4x342xbf16, #tpu.memory_space<vmem>>, %arg2: memref<9x8x4xbf16, #tpu.memory_space<vmem>>, %arg3: memref<1x288xf32, #tpu.memory_space<vmem>>, %arg4: memref<1x8x342xbf16, #tpu.memory_space<vmem>>, %arg5: memref<1x8x2xf32, #tpu.memory_space<vmem>>) attributes {dimension_semantics = [#tpu.dimension_semantics<parallel>], iteration_bounds = array<i64: 2>, scalar_prefetch = 0 : i64, scratch_operands = 0 : i64, tpu.core_type = #tpu.core_type<tc>, window_params = [{transform_indices = @transform_0, window_bounds = array<i64: 1, 4, 342>}, {pipeline_mode = #tpu.pipeline_mode<synchronous>, transform_indices = @transform_1, window_bounds = array<i64: 9, 8, 4>}, {pipeline_mode = #tpu.pipeline_mode<synchronous>, transform_indices = @transform_2, window_bounds = array<i64: 1, 288>}, {transform_indices = @transform_3, window_bounds = array<i64: 1, 8, 342>}, {transform_indices = @transform_4, window_bounds = array<i64: 1, 8, 2>}]} {
    %cst = arith.constant 0.000000e+00 : f32
    %0 = vector.broadcast %cst : f32 to vector<8x288xf32>
    %c0 = arith.constant 0 : index
    %c0_0 = arith.constant 0 : index
    %c0_1 = arith.constant 0 : index
    %1 = vector.load %arg1[%c0, %c0_0, %c0_1] : memref<1x4x342xbf16, #tpu.memory_space<vmem>>, vector<1x4x288xbf16>
    %2 = vector.shape_cast %1 : vector<1x4x288xbf16> to vector<4x288xbf16>
    %c0_2 = arith.constant 0 : index
    %c0_3 = arith.constant 0 : index
    %c0_4 = arith.constant 0 : index
    %3 = vector.load %arg2[%c0_2, %c0_3, %c0_4] : memref<9x8x4xbf16, #tpu.memory_space<vmem>>, vector<1x8x4xbf16>
    %4 = vector.shape_cast %3 : vector<1x8x4xbf16> to vector<8x4xbf16>
    %cst_5 = arith.constant dense<0.000000e+00> : vector<8x288xf32>
    %5 = tpu.matmul %4, %2, %cst_5 {dimension_numbers = #tpu.dot_dimension_numbers<[1], [0], [0], [1], [0, 0, 1, 1], [], []>} : vector<8x4xbf16>, vector<4x288xbf16>, vector<8x288xf32> -> vector<8x288xf32>
    %6 = arith.addf %0, %5 : vector<8x288xf32>
    %c0_6 = arith.constant 0 : index
    %c0_7 = arith.constant 0 : index
    %c1 = arith.constant 1 : index
    %7 = vector.load %arg1[%c0_6, %c0_7, %c1] : memref<1x4x342xbf16, #tpu.memory_space<vmem>>, vector<1x4x288xbf16>
    %8 = vector.shape_cast %7 : vector<1x4x288xbf16> to vector<4x288xbf16>
    %c1_8 = arith.constant 1 : index
    %c0_9 = arith.constant 0 : index
    %c0_10 = arith.constant 0 : index
    %9 = vector.load %arg2[%c1_8, %c0_9, %c0_10] : memref<9x8x4xbf16, #tpu.memory_space<vmem>>, vector<1x8x4xbf16>
    %10 = vector.shape_cast %9 : vector<1x8x4xbf16> to vector<8x4xbf16>
    %cst_11 = arith.constant dense<0.000000e+00> : vector<8x288xf32>
    %11 = tpu.matmul %10, %8, %cst_11 {dimension_numbers = #tpu.dot_dimension_numbers<[1], [0], [0], [1], [0, 0, 1, 1], [], []>} : vector<8x4xbf16>, vector<4x288xbf16>, vector<8x288xf32> -> vector<8x288xf32>
    %12 = arith.addf %6, %11 : vector<8x288xf32>
    %c0_12 = arith.constant 0 : index
    %c0_13 = arith.constant 0 : index
    %c2 = arith.constant 2 : index
    %13 = vector.load %arg1[%c0_12, %c0_13, %c2] : memref<1x4x342xbf16, #tpu.memory_space<vmem>>, vector<1x4x288xbf16>
    %14 = vector.shape_cast %13 : vector<1x4x288xbf16> to vector<4x288xbf16>
    %c2_14 = arith.constant 2 : index
    %c0_15 = arith.constant 0 : index
    %c0_16 = arith.constant 0 : index
    %15 = vector.load %arg2[%c2_14, %c0_15, %c0_16] : memref<9x8x4xbf16, #tpu.memory_space<vmem>>, vector<1x8x4xbf16>
    %16 = vector.shape_cast %15 : vector<1x8x4xbf16> to vector<8x4xbf16>
    %cst_17 = arith.constant dense<0.000000e+00> : vector<8x288xf32>
    %17 = tpu.matmul %16, %14, %cst_17 {dimension_numbers = #tpu.dot_dimension_numbers<[1], [0], [0], [1], [0, 0, 1, 1], [], []>} : vector<8x4xbf16>, vector<4x288xbf16>, vector<8x288xf32> -> vector<8x288xf32>
    %18 = arith.addf %12, %17 : vector<8x288xf32>
    %c0_18 = arith.constant 0 : index
    %c0_19 = arith.constant 0 : index
    %c18 = arith.constant 18 : index
    %19 = vector.load %arg1[%c0_18, %c0_19, %c18] : memref<1x4x342xbf16, #tpu.memory_space<vmem>>, vector<1x4x288xbf16>
    %20 = vector.shape_cast %19 : vector<1x4x288xbf16> to vector<4x288xbf16>
    %c3 = arith.constant 3 : index
    %c0_20 = arith.constant 0 : index
    %c0_21 = arith.constant 0 : index
    %21 = vector.load %arg2[%c3, %c0_20, %c0_21] : memref<9x8x4xbf16, #tpu.memory_space<vmem>>, vector<1x8x4xbf16>
    %22 = vector.shape_cast %21 : vector<1x8x4xbf16> to vector<8x4xbf16>
    %cst_22 = arith.constant dense<0.000000e+00> : vector<8x288xf32>
    %23 = tpu.matmul %22, %20, %cst_22 {dimension_numbers = #tpu.dot_dimension_numbers<[1], [0], [0], [1], [0, 0, 1, 1], [], []>} : vector<8x4xbf16>, vector<4x288xbf16>, vector<8x288xf32> -> vector<8x288xf32>
    %24 = arith.addf %18, %23 : vector<8x288xf32>
    %c0_23 = arith.constant 0 : index
    %c0_24 = arith.constant 0 : index
    %c19 = arith.constant 19 : index
    %25 = vector.load %arg1[%c0_23, %c0_24, %c19] : memref<1x4x342xbf16, #tpu.memory_space<vmem>>, vector<1x4x288xbf16>
    %26 = vector.shape_cast %25 : vector<1x4x288xbf16> to vector<4x288xbf16>
    %c4 = arith.constant 4 : index
    %c0_25 = arith.constant 0 : index
    %c0_26 = arith.constant 0 : index
    %27 = vector.load %arg2[%c4, %c0_25, %c0_26] : memref<9x8x4xbf16, #tpu.memory_space<vmem>>, vector<1x8x4xbf16>
    %28 = vector.shape_cast %27 : vector<1x8x4xbf16> to vector<8x4xbf16>
    %cst_27 = arith.constant dense<0.000000e+00> : vector<8x288xf32>
    %29 = tpu.matmul %28, %26, %cst_27 {dimension_numbers = #tpu.dot_dimension_numbers<[1], [0], [0], [1], [0, 0, 1, 1], [], []>} : vector<8x4xbf16>, vector<4x288xbf16>, vector<8x288xf32> -> vector<8x288xf32>
    %30 = arith.addf %24, %29 : vector<8x288xf32>
    %c0_28 = arith.constant 0 : index
    %c0_29 = arith.constant 0 : index
    %c20 = arith.constant 20 : index
    %31 = vector.load %arg1[%c0_28, %c0_29, %c20] : memref<1x4x342xbf16, #tpu.memory_space<vmem>>, vector<1x4x288xbf16>
    %32 = vector.shape_cast %31 : vector<1x4x288xbf16> to vector<4x288xbf16>
    %c5 = arith.constant 5 : index
    %c0_30 = arith.constant 0 : index
    %c0_31 = arith.constant 0 : index
    %33 = vector.load %arg2[%c5, %c0_30, %c0_31] : memref<9x8x4xbf16, #tpu.memory_space<vmem>>, vector<1x8x4xbf16>
    %34 = vector.shape_cast %33 : vector<1x8x4xbf16> to vector<8x4xbf16>
    %cst_32 = arith.constant dense<0.000000e+00> : vector<8x288xf32>
    %35 = tpu.matmul %34, %32, %cst_32 {dimension_numbers = #tpu.dot_dimension_numbers<[1], [0], [0], [1], [0, 0, 1, 1], [], []>} : vector<8x4xbf16>, vector<4x288xbf16>, vector<8x288xf32> -> vector<8x288xf32>
    %36 = arith.addf %30, %35 : vector<8x288xf32>
    %c0_33 = arith.constant 0 : index
    %c0_34 = arith.constant 0 : index
    %c36 = arith.constant 36 : index
    %37 = vector.load %arg1[%c0_33, %c0_34, %c36] : memref<1x4x342xbf16, #tpu.memory_space<vmem>>, vector<1x4x288xbf16>
    %38 = vector.shape_cast %37 : vector<1x4x288xbf16> to vector<4x288xbf16>
    %c6 = arith.constant 6 : index
    %c0_35 = arith.constant 0 : index
    %c0_36 = arith.constant 0 : index
    %39 = vector.load %arg2[%c6, %c0_35, %c0_36] : memref<9x8x4xbf16, #tpu.memory_space<vmem>>, vector<1x8x4xbf16>
    %40 = vector.shape_cast %39 : vector<1x8x4xbf16> to vector<8x4xbf16>
    %cst_37 = arith.constant dense<0.000000e+00> : vector<8x288xf32>
    %41 = tpu.matmul %40, %38, %cst_37 {dimension_numbers = #tpu.dot_dimension_numbers<[1], [0], [0], [1], [0, 0, 1, 1], [], []>} : vector<8x4xbf16>, vector<4x288xbf16>, vector<8x288xf32> -> vector<8x288xf32>
    %42 = arith.addf %36, %41 : vector<8x288xf32>
    %c0_38 = arith.constant 0 : index
    %c0_39 = arith.constant 0 : index
    %c37 = arith.constant 37 : index
    %43 = vector.load %arg1[%c0_38, %c0_39, %c37] : memref<1x4x342xbf16, #tpu.memory_space<vmem>>, vector<1x4x288xbf16>
    %44 = vector.shape_cast %43 : vector<1x4x288xbf16> to vector<4x288xbf16>
    %c7 = arith.constant 7 : index
    %c0_40 = arith.constant 0 : index
    %c0_41 = arith.constant 0 : index
    %45 = vector.load %arg2[%c7, %c0_40, %c0_41] : memref<9x8x4xbf16, #tpu.memory_space<vmem>>, vector<1x8x4xbf16>
    %46 = vector.shape_cast %45 : vector<1x8x4xbf16> to vector<8x4xbf16>
    %cst_42 = arith.constant dense<0.000000e+00> : vector<8x288xf32>
    %47 = tpu.matmul %46, %44, %cst_42 {dimension_numbers = #tpu.dot_dimension_numbers<[1], [0], [0], [1], [0, 0, 1, 1], [], []>} : vector<8x4xbf16>, vector<4x288xbf16>, vector<8x288xf32> -> vector<8x288xf32>
    %48 = arith.addf %42, %47 : vector<8x288xf32>
    %c0_43 = arith.constant 0 : index
    %c0_44 = arith.constant 0 : index
    %c38 = arith.constant 38 : index
    %49 = vector.load %arg1[%c0_43, %c0_44, %c38] : memref<1x4x342xbf16, #tpu.memory_space<vmem>>, vector<1x4x288xbf16>
    %50 = vector.shape_cast %49 : vector<1x4x288xbf16> to vector<4x288xbf16>
    %c8 = arith.constant 8 : index
    %c0_45 = arith.constant 0 : index
    %c0_46 = arith.constant 0 : index
    %51 = vector.load %arg2[%c8, %c0_45, %c0_46] : memref<9x8x4xbf16, #tpu.memory_space<vmem>>, vector<1x8x4xbf16>
    %52 = vector.shape_cast %51 : vector<1x8x4xbf16> to vector<8x4xbf16>
    %cst_47 = arith.constant dense<0.000000e+00> : vector<8x288xf32>
    %53 = tpu.matmul %52, %50, %cst_47 {dimension_numbers = #tpu.dot_dimension_numbers<[1], [0], [0], [1], [0, 0, 1, 1], [], []>} : vector<8x4xbf16>, vector<4x288xbf16>, vector<8x288xf32> -> vector<8x288xf32>
    %54 = arith.addf %48, %53 : vector<8x288xf32>
    %c0_48 = arith.constant 0 : index
    %c0_49 = arith.constant 0 : index
    %55 = vector.load %arg3[%c0_48, %c0_49] : memref<1x288xf32, #tpu.memory_space<vmem>>, vector<1x288xf32>
    %56 = vector.broadcast %55 : vector<1x288xf32> to vector<8x288xf32>
    %57 = arith.mulf %54, %56 : vector<8x288xf32>
    %cst_50 = arith.constant dense<0.000000e+00> : vector<8xf32>
    %58 = vector.multi_reduction <add>, %57, %cst_50 [1] : vector<8x288xf32> to vector<8xf32>
    %59 = vector.shape_cast %58 : vector<8xf32> to vector<8x1xf32>
    %c0_51 = arith.constant 0 : index
    %c0_52 = arith.constant 0 : index
    %c0_53 = arith.constant 0 : index
    %60 = vector.load %arg5[%c0_51, %c0_52, %c0_53] : memref<1x8x2xf32, #tpu.memory_space<vmem>>, vector<1x8x1xf32>
    %61 = vector.shape_cast %60 : vector<1x8x1xf32> to vector<8x1xf32>
    %62 = vector.shape_cast %59 : vector<8x1xf32> to vector<1x8x1xf32>
    tpu.vector_store %arg5[%c0_51, %c0_52, %c0_53], %62 {strides = array<i32>} : memref<1x8x2xf32, #tpu.memory_space<vmem>>, vector<1x8x1xf32>,
    %63 = arith.mulf %57, %57 : vector<8x288xf32>
    %cst_54 = arith.constant dense<0.000000e+00> : vector<8xf32>
    %64 = vector.multi_reduction <add>, %63, %cst_54 [1] : vector<8x288xf32> to vector<8xf32>
    %65 = vector.shape_cast %64 : vector<8xf32> to vector<8x1xf32>
    %c0_55 = arith.constant 0 : index
    %c0_56 = arith.constant 0 : index
    %c1_57 = arith.constant 1 : index
    %66 = vector.load %arg5[%c0_55, %c0_56, %c1_57] : memref<1x8x2xf32, #tpu.memory_space<vmem>>, vector<1x8x1xf32>
    %67 = vector.shape_cast %66 : vector<1x8x1xf32> to vector<8x1xf32>
    %68 = vector.shape_cast %65 : vector<8x1xf32> to vector<1x8x1xf32>
    tpu.vector_store %arg5[%c0_55, %c0_56, %c1_57], %68 {strides = array<i32>} : memref<1x8x2xf32, #tpu.memory_space<vmem>>, vector<1x8x1xf32>,
    %cst_58 = arith.constant 0.000000e+00 : bf16
    %69 = vector.broadcast %cst_58 : bf16 to vector<8x19xbf16>
    %c0_59 = arith.constant 0 : index
    %c0_60 = arith.constant 0 : index
    %c0_61 = arith.constant 0 : index
    %70 = vector.load %arg4[%c0_59, %c0_60, %c0_61] : memref<1x8x342xbf16, #tpu.memory_space<vmem>>, vector<1x8x19xbf16>
    %71 = vector.shape_cast %70 : vector<1x8x19xbf16> to vector<8x19xbf16>
    %72 = vector.shape_cast %69 : vector<8x19xbf16> to vector<1x8x19xbf16>
    tpu.vector_store %arg4[%c0_59, %c0_60, %c0_61], %72 {strides = array<i32>} : memref<1x8x342xbf16, #tpu.memory_space<vmem>>, vector<1x8x19xbf16>,
    %73 = arith.truncf %57 : vector<8x288xf32> to vector<8x288xbf16>
    %c0_62 = arith.constant 0 : index
    %c0_63 = arith.constant 0 : index
    %c19_64 = arith.constant 19 : index
    %74 = vector.load %arg4[%c0_62, %c0_63, %c19_64] : memref<1x8x342xbf16, #tpu.memory_space<vmem>>, vector<1x8x288xbf16>
    %75 = vector.shape_cast %74 : vector<1x8x288xbf16> to vector<8x288xbf16>
    %76 = vector.shape_cast %73 : vector<8x288xbf16> to vector<1x8x288xbf16>
    tpu.vector_store %arg4[%c0_62, %c0_63, %c19_64], %76 {strides = array<i32>} : memref<1x8x342xbf16, #tpu.memory_space<vmem>>, vector<1x8x288xbf16>,
    %cst_65 = arith.constant 0.000000e+00 : bf16
    %77 = vector.broadcast %cst_65 : bf16 to vector<8x35xbf16>
    %c0_66 = arith.constant 0 : index
    %c0_67 = arith.constant 0 : index
    %c307 = arith.constant 307 : index
    %78 = vector.load %arg4[%c0_66, %c0_67, %c307] : memref<1x8x342xbf16, #tpu.memory_space<vmem>>, vector<1x8x35xbf16>
    %79 = vector.shape_cast %78 : vector<1x8x35xbf16> to vector<8x35xbf16>
    %80 = vector.shape_cast %77 : vector<8x35xbf16> to vector<1x8x35xbf16>
    tpu.vector_store %arg4[%c0_66, %c0_67, %c307], %80 {strides = array<i32>} : memref<1x8x342xbf16, #tpu.memory_space<vmem>>, vector<1x8x35xbf16>,
    return
  }
  func.func @transform_0(%arg0: i32) -> (i32, i32, i32) {
    %c0_i32 = arith.constant 0 : i32
    %c0_i32_0 = arith.constant 0 : i32
    %c0_i32_1 = arith.constant 0 : i32
    return %arg0, %c0_i32, %c0_i32_0 : i32, i32, i32
  }
  func.func @transform_1(%arg0: i32) -> (i32, i32, i32) {
    %c0_i32 = arith.constant 0 : i32
    %c0_i32_0 = arith.constant 0 : i32
    %c0_i32_1 = arith.constant 0 : i32
    %c0_i32_2 = arith.constant 0 : i32
    return %c0_i32, %c0_i32_0, %c0_i32_1 : i32, i32, i32
  }
  func.func @transform_2(%arg0: i32) -> (i32, i32) {
    %c0_i32 = arith.constant 0 : i32
    %c0_i32_0 = arith.constant 0 : i32
    %c0_i32_1 = arith.constant 0 : i32
    return %c0_i32, %c0_i32_0 : i32, i32
  }
  func.func @transform_3(%arg0: i32) -> (i32, i32, i32) {
    %c0_i32 = arith.constant 0 : i32
    %c0_i32_0 = arith.constant 0 : i32
    %c0_i32_1 = arith.constant 0 : i32
    return %arg0, %c0_i32, %c0_i32_0 : i32, i32, i32
  }
  func.func @transform_4(%arg0: i32) -> (i32, i32, i32) {
    %c0_i32 = arith.constant 0 : i32
    %c0_i32_0 = arith.constant 0 : i32
    %c0_i32_1 = arith.constant 0 : i32
    return %arg0, %c0_i32, %c0_i32_0 : i32, i32, i32
  }
}

module attributes {stable_mosaic.version = 11 : i64} {
  func.func @_bnrelu_conv2_stats_kernel(%arg0: i32, %arg1: memref<1x8x342xbf16, #tpu.memory_space<vmem>>, %arg2: memref<8x1xf32, #tpu.memory_space<vmem>>, %arg3: memref<8x1xf32, #tpu.memory_space<vmem>>, %arg4: memref<9x8x8xbf16, #tpu.memory_space<vmem>>, %arg5: memref<1x342xf32, #tpu.memory_space<vmem>>, %arg6: memref<1x288xf32, #tpu.memory_space<vmem>>, %arg7: memref<1x8x288xbf16, #tpu.memory_space<vmem>>, %arg8: memref<1x8x2xf32, #tpu.memory_space<vmem>>) attributes {dimension_semantics = [#tpu.dimension_semantics<parallel>], iteration_bounds = array<i64: 2>, scalar_prefetch = 0 : i64, scratch_operands = 0 : i64, tpu.core_type = #tpu.core_type<tc>, window_params = [{transform_indices = @transform_0, window_bounds = array<i64: 1, 8, 342>}, {pipeline_mode = #tpu.pipeline_mode<synchronous>, transform_indices = @transform_1, window_bounds = array<i64: 8, 1>}, {pipeline_mode = #tpu.pipeline_mode<synchronous>, transform_indices = @transform_2, window_bounds = array<i64: 8, 1>}, {pipeline_mode = #tpu.pipeline_mode<synchronous>, transform_indices = @transform_3, window_bounds = array<i64: 9, 8, 8>}, {pipeline_mode = #tpu.pipeline_mode<synchronous>, transform_indices = @transform_4, window_bounds = array<i64: 1, 342>}, {pipeline_mode = #tpu.pipeline_mode<synchronous>, transform_indices = @transform_5, window_bounds = array<i64: 1, 288>}, {transform_indices = @transform_6, window_bounds = array<i64: 1, 8, 288>}, {transform_indices = @transform_7, window_bounds = array<i64: 1, 8, 2>}]} {
    %c0 = arith.constant 0 : index
    %c0_0 = arith.constant 0 : index
    %c0_1 = arith.constant 0 : index
    %0 = vector.load %arg1[%c0, %c0_0, %c0_1] : memref<1x8x342xbf16, #tpu.memory_space<vmem>>, vector<1x8x342xbf16>
    %1 = vector.shape_cast %0 : vector<1x8x342xbf16> to vector<8x342xbf16>
    %2 = arith.extf %1 : vector<8x342xbf16> to vector<8x342xf32>
    %c0_2 = arith.constant 0 : index
    %c0_3 = arith.constant 0 : index
    %3 = vector.load %arg2[%c0_2, %c0_3] : memref<8x1xf32, #tpu.memory_space<vmem>>, vector<8x1xf32>
    %4 = vector.broadcast %3 : vector<8x1xf32> to vector<8x342xf32>
    %5 = arith.mulf %2, %4 : vector<8x342xf32>
    %c0_4 = arith.constant 0 : index
    %c0_5 = arith.constant 0 : index
    %6 = vector.load %arg3[%c0_4, %c0_5] : memref<8x1xf32, #tpu.memory_space<vmem>>, vector<8x1xf32>
    %7 = vector.broadcast %6 : vector<8x1xf32> to vector<8x342xf32>
    %8 = arith.addf %5, %7 : vector<8x342xf32>
    %cst = arith.constant 0.000000e+00 : f32
    %9 = vector.broadcast %cst : f32 to vector<8x342xf32>
    %10 = arith.maximumf %8, %9 : vector<8x342xf32>
    %c0_6 = arith.constant 0 : index
    %c0_7 = arith.constant 0 : index
    %11 = vector.load %arg5[%c0_6, %c0_7] : memref<1x342xf32, #tpu.memory_space<vmem>>, vector<1x342xf32>
    %12 = vector.broadcast %11 : vector<1x342xf32> to vector<8x342xf32>
    %13 = arith.mulf %10, %12 : vector<8x342xf32>
    %14 = arith.truncf %13 : vector<8x342xf32> to vector<8x342xbf16>
    %cst_8 = arith.constant 0.000000e+00 : f32
    %15 = vector.broadcast %cst_8 : f32 to vector<8x288xf32>
    %c0_9 = arith.constant 0 : index
    %c0_10 = arith.constant 0 : index
    %c0_11 = arith.constant 0 : index
    %16 = vector.load %arg4[%c0_9, %c0_10, %c0_11] : memref<9x8x8xbf16, #tpu.memory_space<vmem>>, vector<1x8x8xbf16>
    %17 = vector.shape_cast %16 : vector<1x8x8xbf16> to vector<8x8xbf16>
    %18 = vector.extract_strided_slice %14 {offsets = [0, 0], sizes = [8, 288], strides = [1, 1]} : vector<8x342xbf16> to vector<8x288xbf16>
    %cst_12 = arith.constant dense<0.000000e+00> : vector<8x288xf32>
    %19 = tpu.matmul %17, %18, %cst_12 {dimension_numbers = #tpu.dot_dimension_numbers<[1], [0], [0], [1], [0, 0, 1, 1], [], []>} : vector<8x8xbf16>, vector<8x288xbf16>, vector<8x288xf32> -> vector<8x288xf32>
    %20 = arith.addf %15, %19 : vector<8x288xf32>
    %c1 = arith.constant 1 : index
    %c0_13 = arith.constant 0 : index
    %c0_14 = arith.constant 0 : index
    %21 = vector.load %arg4[%c1, %c0_13, %c0_14] : memref<9x8x8xbf16, #tpu.memory_space<vmem>>, vector<1x8x8xbf16>
    %22 = vector.shape_cast %21 : vector<1x8x8xbf16> to vector<8x8xbf16>
    %23 = vector.extract_strided_slice %14 {offsets = [0, 1], sizes = [8, 288], strides = [1, 1]} : vector<8x342xbf16> to vector<8x288xbf16>
    %cst_15 = arith.constant dense<0.000000e+00> : vector<8x288xf32>
    %24 = tpu.matmul %22, %23, %cst_15 {dimension_numbers = #tpu.dot_dimension_numbers<[1], [0], [0], [1], [0, 0, 1, 1], [], []>} : vector<8x8xbf16>, vector<8x288xbf16>, vector<8x288xf32> -> vector<8x288xf32>
    %25 = arith.addf %20, %24 : vector<8x288xf32>
    %c2 = arith.constant 2 : index
    %c0_16 = arith.constant 0 : index
    %c0_17 = arith.constant 0 : index
    %26 = vector.load %arg4[%c2, %c0_16, %c0_17] : memref<9x8x8xbf16, #tpu.memory_space<vmem>>, vector<1x8x8xbf16>
    %27 = vector.shape_cast %26 : vector<1x8x8xbf16> to vector<8x8xbf16>
    %28 = vector.extract_strided_slice %14 {offsets = [0, 2], sizes = [8, 288], strides = [1, 1]} : vector<8x342xbf16> to vector<8x288xbf16>
    %cst_18 = arith.constant dense<0.000000e+00> : vector<8x288xf32>
    %29 = tpu.matmul %27, %28, %cst_18 {dimension_numbers = #tpu.dot_dimension_numbers<[1], [0], [0], [1], [0, 0, 1, 1], [], []>} : vector<8x8xbf16>, vector<8x288xbf16>, vector<8x288xf32> -> vector<8x288xf32>
    %30 = arith.addf %25, %29 : vector<8x288xf32>
    %c3 = arith.constant 3 : index
    %c0_19 = arith.constant 0 : index
    %c0_20 = arith.constant 0 : index
    %31 = vector.load %arg4[%c3, %c0_19, %c0_20] : memref<9x8x8xbf16, #tpu.memory_space<vmem>>, vector<1x8x8xbf16>
    %32 = vector.shape_cast %31 : vector<1x8x8xbf16> to vector<8x8xbf16>
    %33 = vector.extract_strided_slice %14 {offsets = [0, 18], sizes = [8, 288], strides = [1, 1]} : vector<8x342xbf16> to vector<8x288xbf16>
    %cst_21 = arith.constant dense<0.000000e+00> : vector<8x288xf32>
    %34 = tpu.matmul %32, %33, %cst_21 {dimension_numbers = #tpu.dot_dimension_numbers<[1], [0], [0], [1], [0, 0, 1, 1], [], []>} : vector<8x8xbf16>, vector<8x288xbf16>, vector<8x288xf32> -> vector<8x288xf32>
    %35 = arith.addf %30, %34 : vector<8x288xf32>
    %c4 = arith.constant 4 : index
    %c0_22 = arith.constant 0 : index
    %c0_23 = arith.constant 0 : index
    %36 = vector.load %arg4[%c4, %c0_22, %c0_23] : memref<9x8x8xbf16, #tpu.memory_space<vmem>>, vector<1x8x8xbf16>
    %37 = vector.shape_cast %36 : vector<1x8x8xbf16> to vector<8x8xbf16>
    %38 = vector.extract_strided_slice %14 {offsets = [0, 19], sizes = [8, 288], strides = [1, 1]} : vector<8x342xbf16> to vector<8x288xbf16>
    %cst_24 = arith.constant dense<0.000000e+00> : vector<8x288xf32>
    %39 = tpu.matmul %37, %38, %cst_24 {dimension_numbers = #tpu.dot_dimension_numbers<[1], [0], [0], [1], [0, 0, 1, 1], [], []>} : vector<8x8xbf16>, vector<8x288xbf16>, vector<8x288xf32> -> vector<8x288xf32>
    %40 = arith.addf %35, %39 : vector<8x288xf32>
    %c5 = arith.constant 5 : index
    %c0_25 = arith.constant 0 : index
    %c0_26 = arith.constant 0 : index
    %41 = vector.load %arg4[%c5, %c0_25, %c0_26] : memref<9x8x8xbf16, #tpu.memory_space<vmem>>, vector<1x8x8xbf16>
    %42 = vector.shape_cast %41 : vector<1x8x8xbf16> to vector<8x8xbf16>
    %43 = vector.extract_strided_slice %14 {offsets = [0, 20], sizes = [8, 288], strides = [1, 1]} : vector<8x342xbf16> to vector<8x288xbf16>
    %cst_27 = arith.constant dense<0.000000e+00> : vector<8x288xf32>
    %44 = tpu.matmul %42, %43, %cst_27 {dimension_numbers = #tpu.dot_dimension_numbers<[1], [0], [0], [1], [0, 0, 1, 1], [], []>} : vector<8x8xbf16>, vector<8x288xbf16>, vector<8x288xf32> -> vector<8x288xf32>
    %45 = arith.addf %40, %44 : vector<8x288xf32>
    %c6 = arith.constant 6 : index
    %c0_28 = arith.constant 0 : index
    %c0_29 = arith.constant 0 : index
    %46 = vector.load %arg4[%c6, %c0_28, %c0_29] : memref<9x8x8xbf16, #tpu.memory_space<vmem>>, vector<1x8x8xbf16>
    %47 = vector.shape_cast %46 : vector<1x8x8xbf16> to vector<8x8xbf16>
    %48 = vector.extract_strided_slice %14 {offsets = [0, 36], sizes = [8, 288], strides = [1, 1]} : vector<8x342xbf16> to vector<8x288xbf16>
    %cst_30 = arith.constant dense<0.000000e+00> : vector<8x288xf32>
    %49 = tpu.matmul %47, %48, %cst_30 {dimension_numbers = #tpu.dot_dimension_numbers<[1], [0], [0], [1], [0, 0, 1, 1], [], []>} : vector<8x8xbf16>, vector<8x288xbf16>, vector<8x288xf32> -> vector<8x288xf32>
    %50 = arith.addf %45, %49 : vector<8x288xf32>
    %c7 = arith.constant 7 : index
    %c0_31 = arith.constant 0 : index
    %c0_32 = arith.constant 0 : index
    %51 = vector.load %arg4[%c7, %c0_31, %c0_32] : memref<9x8x8xbf16, #tpu.memory_space<vmem>>, vector<1x8x8xbf16>
    %52 = vector.shape_cast %51 : vector<1x8x8xbf16> to vector<8x8xbf16>
    %53 = vector.extract_strided_slice %14 {offsets = [0, 37], sizes = [8, 288], strides = [1, 1]} : vector<8x342xbf16> to vector<8x288xbf16>
    %cst_33 = arith.constant dense<0.000000e+00> : vector<8x288xf32>
    %54 = tpu.matmul %52, %53, %cst_33 {dimension_numbers = #tpu.dot_dimension_numbers<[1], [0], [0], [1], [0, 0, 1, 1], [], []>} : vector<8x8xbf16>, vector<8x288xbf16>, vector<8x288xf32> -> vector<8x288xf32>
    %55 = arith.addf %50, %54 : vector<8x288xf32>
    %c8 = arith.constant 8 : index
    %c0_34 = arith.constant 0 : index
    %c0_35 = arith.constant 0 : index
    %56 = vector.load %arg4[%c8, %c0_34, %c0_35] : memref<9x8x8xbf16, #tpu.memory_space<vmem>>, vector<1x8x8xbf16>
    %57 = vector.shape_cast %56 : vector<1x8x8xbf16> to vector<8x8xbf16>
    %58 = vector.extract_strided_slice %14 {offsets = [0, 38], sizes = [8, 288], strides = [1, 1]} : vector<8x342xbf16> to vector<8x288xbf16>
    %cst_36 = arith.constant dense<0.000000e+00> : vector<8x288xf32>
    %59 = tpu.matmul %57, %58, %cst_36 {dimension_numbers = #tpu.dot_dimension_numbers<[1], [0], [0], [1], [0, 0, 1, 1], [], []>} : vector<8x8xbf16>, vector<8x288xbf16>, vector<8x288xf32> -> vector<8x288xf32>
    %60 = arith.addf %55, %59 : vector<8x288xf32>
    %c0_37 = arith.constant 0 : index
    %c0_38 = arith.constant 0 : index
    %61 = vector.load %arg6[%c0_37, %c0_38] : memref<1x288xf32, #tpu.memory_space<vmem>>, vector<1x288xf32>
    %62 = vector.broadcast %61 : vector<1x288xf32> to vector<8x288xf32>
    %63 = arith.mulf %60, %62 : vector<8x288xf32>
    %cst_39 = arith.constant dense<0.000000e+00> : vector<8xf32>
    %64 = vector.multi_reduction <add>, %63, %cst_39 [1] : vector<8x288xf32> to vector<8xf32>
    %65 = vector.shape_cast %64 : vector<8xf32> to vector<8x1xf32>
    %c0_40 = arith.constant 0 : index
    %c0_41 = arith.constant 0 : index
    %c0_42 = arith.constant 0 : index
    %66 = vector.load %arg8[%c0_40, %c0_41, %c0_42] : memref<1x8x2xf32, #tpu.memory_space<vmem>>, vector<1x8x1xf32>
    %67 = vector.shape_cast %66 : vector<1x8x1xf32> to vector<8x1xf32>
    %68 = vector.shape_cast %65 : vector<8x1xf32> to vector<1x8x1xf32>
    tpu.vector_store %arg8[%c0_40, %c0_41, %c0_42], %68 {strides = array<i32>} : memref<1x8x2xf32, #tpu.memory_space<vmem>>, vector<1x8x1xf32>,
    %69 = arith.mulf %63, %63 : vector<8x288xf32>
    %cst_43 = arith.constant dense<0.000000e+00> : vector<8xf32>
    %70 = vector.multi_reduction <add>, %69, %cst_43 [1] : vector<8x288xf32> to vector<8xf32>
    %71 = vector.shape_cast %70 : vector<8xf32> to vector<8x1xf32>
    %c0_44 = arith.constant 0 : index
    %c0_45 = arith.constant 0 : index
    %c1_46 = arith.constant 1 : index
    %72 = vector.load %arg8[%c0_44, %c0_45, %c1_46] : memref<1x8x2xf32, #tpu.memory_space<vmem>>, vector<1x8x1xf32>
    %73 = vector.shape_cast %72 : vector<1x8x1xf32> to vector<8x1xf32>
    %74 = vector.shape_cast %71 : vector<8x1xf32> to vector<1x8x1xf32>
    tpu.vector_store %arg8[%c0_44, %c0_45, %c1_46], %74 {strides = array<i32>} : memref<1x8x2xf32, #tpu.memory_space<vmem>>, vector<1x8x1xf32>,
    %75 = arith.truncf %63 : vector<8x288xf32> to vector<8x288xbf16>
    %c0_47 = arith.constant 0 : index
    %c0_48 = arith.constant 0 : index
    %c0_49 = arith.constant 0 : index
    %76 = vector.load %arg7[%c0_47, %c0_48, %c0_49] : memref<1x8x288xbf16, #tpu.memory_space<vmem>>, vector<1x8x288xbf16>
    %77 = vector.shape_cast %76 : vector<1x8x288xbf16> to vector<8x288xbf16>
    %78 = vector.shape_cast %75 : vector<8x288xbf16> to vector<1x8x288xbf16>
    tpu.vector_store %arg7[%c0_47, %c0_48, %c0_49], %78 {strides = array<i32>} : memref<1x8x288xbf16, #tpu.memory_space<vmem>>, vector<1x8x288xbf16>,
    return
  }
  func.func @transform_0(%arg0: i32) -> (i32, i32, i32) {
    %c0_i32 = arith.constant 0 : i32
    %c0_i32_0 = arith.constant 0 : i32
    %c0_i32_1 = arith.constant 0 : i32
    return %arg0, %c0_i32, %c0_i32_0 : i32, i32, i32
  }
  func.func @transform_1(%arg0: i32) -> (i32, i32) {
    %c0_i32 = arith.constant 0 : i32
    %c0_i32_0 = arith.constant 0 : i32
    %c0_i32_1 = arith.constant 0 : i32
    return %c0_i32, %c0_i32_0 : i32, i32
  }
  func.func @transform_2(%arg0: i32) -> (i32, i32) {
    %c0_i32 = arith.constant 0 : i32
    %c0_i32_0 = arith.constant 0 : i32
    %c0_i32_1 = arith.constant 0 : i32
    return %c0_i32, %c0_i32_0 : i32, i32
  }
  func.func @transform_3(%arg0: i32) -> (i32, i32, i32) {
    %c0_i32 = arith.constant 0 : i32
    %c0_i32_0 = arith.constant 0 : i32
    %c0_i32_1 = arith.constant 0 : i32
    %c0_i32_2 = arith.constant 0 : i32
    return %c0_i32, %c0_i32_0, %c0_i32_1 : i32, i32, i32
  }
  func.func @transform_4(%arg0: i32) -> (i32, i32) {
    %c0_i32 = arith.constant 0 : i32
    %c0_i32_0 = arith.constant 0 : i32
    %c0_i32_1 = arith.constant 0 : i32
    return %c0_i32, %c0_i32_0 : i32, i32
  }
  func.func @transform_5(%arg0: i32) -> (i32, i32) {
    %c0_i32 = arith.constant 0 : i32
    %c0_i32_0 = arith.constant 0 : i32
    %c0_i32_1 = arith.constant 0 : i32
    return %c0_i32, %c0_i32_0 : i32, i32
  }
  func.func @transform_6(%arg0: i32) -> (i32, i32, i32) {
    %c0_i32 = arith.constant 0 : i32
    %c0_i32_0 = arith.constant 0 : i32
    %c0_i32_1 = arith.constant 0 : i32
    return %arg0, %c0_i32, %c0_i32_0 : i32, i32, i32
  }
  func.func @transform_7(%arg0: i32) -> (i32, i32, i32) {
    %c0_i32 = arith.constant 0 : i32
    %c0_i32_0 = arith.constant 0 : i32
    %c0_i32_1 = arith.constant 0 : i32
    return %arg0, %c0_i32, %c0_i32_0 : i32, i32, i32
  }
}

module attributes {stable_mosaic.version = 11 : i64} {
  func.func @_bnrelu_out_kernel(%arg0: i32, %arg1: memref<1x8x288xbf16, #tpu.memory_space<vmem>>, %arg2: memref<8x1xf32, #tpu.memory_space<vmem>>, %arg3: memref<8x1xf32, #tpu.memory_space<vmem>>, %arg4: memref<1x8x256xf32, #tpu.memory_space<vmem>>) attributes {dimension_semantics = [#tpu.dimension_semantics<parallel>], iteration_bounds = array<i64: 2>, scalar_prefetch = 0 : i64, scratch_operands = 0 : i64, tpu.core_type = #tpu.core_type<tc>, window_params = [{transform_indices = @transform_0, window_bounds = array<i64: 1, 8, 288>}, {pipeline_mode = #tpu.pipeline_mode<synchronous>, transform_indices = @transform_1, window_bounds = array<i64: 8, 1>}, {pipeline_mode = #tpu.pipeline_mode<synchronous>, transform_indices = @transform_2, window_bounds = array<i64: 8, 1>}, {transform_indices = @transform_3, window_bounds = array<i64: 1, 8, 256>}]} {
    %c0 = arith.constant 0 : index
    %c0_0 = arith.constant 0 : index
    %c0_1 = arith.constant 0 : index
    %0 = vector.load %arg1[%c0, %c0_0, %c0_1] : memref<1x8x288xbf16, #tpu.memory_space<vmem>>, vector<1x8x288xbf16>
    %1 = vector.shape_cast %0 : vector<1x8x288xbf16> to vector<8x288xbf16>
    %2 = arith.extf %1 : vector<8x288xbf16> to vector<8x288xf32>
    %c0_2 = arith.constant 0 : index
    %c0_3 = arith.constant 0 : index
    %3 = vector.load %arg2[%c0_2, %c0_3] : memref<8x1xf32, #tpu.memory_space<vmem>>, vector<8x1xf32>
    %4 = vector.broadcast %3 : vector<8x1xf32> to vector<8x288xf32>
    %5 = arith.mulf %2, %4 : vector<8x288xf32>
    %c0_4 = arith.constant 0 : index
    %c0_5 = arith.constant 0 : index
    %6 = vector.load %arg3[%c0_4, %c0_5] : memref<8x1xf32, #tpu.memory_space<vmem>>, vector<8x1xf32>
    %7 = vector.broadcast %6 : vector<8x1xf32> to vector<8x288xf32>
    %8 = arith.addf %5, %7 : vector<8x288xf32>
    %cst = arith.constant 0.000000e+00 : f32
    %9 = vector.broadcast %cst : f32 to vector<8x288xf32>
    %10 = arith.maximumf %8, %9 : vector<8x288xf32>
    %11 = vector.extract_strided_slice %10 {offsets = [0, 0], sizes = [8, 16], strides = [1, 1]} : vector<8x288xf32> to vector<8x16xf32>
    %c0_6 = arith.constant 0 : index
    %c0_7 = arith.constant 0 : index
    %c0_8 = arith.constant 0 : index
    %12 = vector.load %arg4[%c0_6, %c0_7, %c0_8] : memref<1x8x256xf32, #tpu.memory_space<vmem>>, vector<1x8x16xf32>
    %13 = vector.shape_cast %12 : vector<1x8x16xf32> to vector<8x16xf32>
    %14 = vector.shape_cast %11 : vector<8x16xf32> to vector<1x8x16xf32>
    tpu.vector_store %arg4[%c0_6, %c0_7, %c0_8], %14 {strides = array<i32>} : memref<1x8x256xf32, #tpu.memory_space<vmem>>, vector<1x8x16xf32>,
    %15 = vector.extract_strided_slice %10 {offsets = [0, 18], sizes = [8, 16], strides = [1, 1]} : vector<8x288xf32> to vector<8x16xf32>
    %c0_9 = arith.constant 0 : index
    %c0_10 = arith.constant 0 : index
    %c16 = arith.constant 16 : index
    %16 = vector.load %arg4[%c0_9, %c0_10, %c16] : memref<1x8x256xf32, #tpu.memory_space<vmem>>, vector<1x8x16xf32>
    %17 = vector.shape_cast %16 : vector<1x8x16xf32> to vector<8x16xf32>
    %18 = vector.shape_cast %15 : vector<8x16xf32> to vector<1x8x16xf32>
    tpu.vector_store %arg4[%c0_9, %c0_10, %c16], %18 {strides = array<i32>} : memref<1x8x256xf32, #tpu.memory_space<vmem>>, vector<1x8x16xf32>,
    %19 = vector.extract_strided_slice %10 {offsets = [0, 36], sizes = [8, 16], strides = [1, 1]} : vector<8x288xf32> to vector<8x16xf32>
    %c0_11 = arith.constant 0 : index
    %c0_12 = arith.constant 0 : index
    %c32 = arith.constant 32 : index
    %20 = vector.load %arg4[%c0_11, %c0_12, %c32] : memref<1x8x256xf32, #tpu.memory_space<vmem>>, vector<1x8x16xf32>
    %21 = vector.shape_cast %20 : vector<1x8x16xf32> to vector<8x16xf32>
    %22 = vector.shape_cast %19 : vector<8x16xf32> to vector<1x8x16xf32>
    tpu.vector_store %arg4[%c0_11, %c0_12, %c32], %22 {strides = array<i32>} : memref<1x8x256xf32, #tpu.memory_space<vmem>>, vector<1x8x16xf32>,
    %23 = vector.extract_strided_slice %10 {offsets = [0, 54], sizes = [8, 16], strides = [1, 1]} : vector<8x288xf32> to vector<8x16xf32>
    %c0_13 = arith.constant 0 : index
    %c0_14 = arith.constant 0 : index
    %c48 = arith.constant 48 : index
    %24 = vector.load %arg4[%c0_13, %c0_14, %c48] : memref<1x8x256xf32, #tpu.memory_space<vmem>>, vector<1x8x16xf32>
    %25 = vector.shape_cast %24 : vector<1x8x16xf32> to vector<8x16xf32>
    %26 = vector.shape_cast %23 : vector<8x16xf32> to vector<1x8x16xf32>
    tpu.vector_store %arg4[%c0_13, %c0_14, %c48], %26 {strides = array<i32>} : memref<1x8x256xf32, #tpu.memory_space<vmem>>, vector<1x8x16xf32>,
    %27 = vector.extract_strided_slice %10 {offsets = [0, 72], sizes = [8, 16], strides = [1, 1]} : vector<8x288xf32> to vector<8x16xf32>
    %c0_15 = arith.constant 0 : index
    %c0_16 = arith.constant 0 : index
    %c64 = arith.constant 64 : index
    %28 = vector.load %arg4[%c0_15, %c0_16, %c64] : memref<1x8x256xf32, #tpu.memory_space<vmem>>, vector<1x8x16xf32>
    %29 = vector.shape_cast %28 : vector<1x8x16xf32> to vector<8x16xf32>
    %30 = vector.shape_cast %27 : vector<8x16xf32> to vector<1x8x16xf32>
    tpu.vector_store %arg4[%c0_15, %c0_16, %c64], %30 {strides = array<i32>} : memref<1x8x256xf32, #tpu.memory_space<vmem>>, vector<1x8x16xf32>,
    %31 = vector.extract_strided_slice %10 {offsets = [0, 90], sizes = [8, 16], strides = [1, 1]} : vector<8x288xf32> to vector<8x16xf32>
    %c0_17 = arith.constant 0 : index
    %c0_18 = arith.constant 0 : index
    %c80 = arith.constant 80 : index
    %32 = vector.load %arg4[%c0_17, %c0_18, %c80] : memref<1x8x256xf32, #tpu.memory_space<vmem>>, vector<1x8x16xf32>
    %33 = vector.shape_cast %32 : vector<1x8x16xf32> to vector<8x16xf32>
    %34 = vector.shape_cast %31 : vector<8x16xf32> to vector<1x8x16xf32>
    tpu.vector_store %arg4[%c0_17, %c0_18, %c80], %34 {strides = array<i32>} : memref<1x8x256xf32, #tpu.memory_space<vmem>>, vector<1x8x16xf32>,
    %35 = vector.extract_strided_slice %10 {offsets = [0, 108], sizes = [8, 16], strides = [1, 1]} : vector<8x288xf32> to vector<8x16xf32>
    %c0_19 = arith.constant 0 : index
    %c0_20 = arith.constant 0 : index
    %c96 = arith.constant 96 : index
    %36 = vector.load %arg4[%c0_19, %c0_20, %c96] : memref<1x8x256xf32, #tpu.memory_space<vmem>>, vector<1x8x16xf32>
    %37 = vector.shape_cast %36 : vector<1x8x16xf32> to vector<8x16xf32>
    %38 = vector.shape_cast %35 : vector<8x16xf32> to vector<1x8x16xf32>
    tpu.vector_store %arg4[%c0_19, %c0_20, %c96], %38 {strides = array<i32>} : memref<1x8x256xf32, #tpu.memory_space<vmem>>, vector<1x8x16xf32>,
    %39 = vector.extract_strided_slice %10 {offsets = [0, 126], sizes = [8, 16], strides = [1, 1]} : vector<8x288xf32> to vector<8x16xf32>
    %c0_21 = arith.constant 0 : index
    %c0_22 = arith.constant 0 : index
    %c112 = arith.constant 112 : index
    %40 = vector.load %arg4[%c0_21, %c0_22, %c112] : memref<1x8x256xf32, #tpu.memory_space<vmem>>, vector<1x8x16xf32>
    %41 = vector.shape_cast %40 : vector<1x8x16xf32> to vector<8x16xf32>
    %42 = vector.shape_cast %39 : vector<8x16xf32> to vector<1x8x16xf32>
    tpu.vector_store %arg4[%c0_21, %c0_22, %c112], %42 {strides = array<i32>} : memref<1x8x256xf32, #tpu.memory_space<vmem>>, vector<1x8x16xf32>,
    %43 = vector.extract_strided_slice %10 {offsets = [0, 144], sizes = [8, 16], strides = [1, 1]} : vector<8x288xf32> to vector<8x16xf32>
    %c0_23 = arith.constant 0 : index
    %c0_24 = arith.constant 0 : index
    %c128 = arith.constant 128 : index
    %44 = vector.load %arg4[%c0_23, %c0_24, %c128] : memref<1x8x256xf32, #tpu.memory_space<vmem>>, vector<1x8x16xf32>
    %45 = vector.shape_cast %44 : vector<1x8x16xf32> to vector<8x16xf32>
    %46 = vector.shape_cast %43 : vector<8x16xf32> to vector<1x8x16xf32>
    tpu.vector_store %arg4[%c0_23, %c0_24, %c128], %46 {strides = array<i32>} : memref<1x8x256xf32, #tpu.memory_space<vmem>>, vector<1x8x16xf32>,
    %47 = vector.extract_strided_slice %10 {offsets = [0, 162], sizes = [8, 16], strides = [1, 1]} : vector<8x288xf32> to vector<8x16xf32>
    %c0_25 = arith.constant 0 : index
    %c0_26 = arith.constant 0 : index
    %c144 = arith.constant 144 : index
    %48 = vector.load %arg4[%c0_25, %c0_26, %c144] : memref<1x8x256xf32, #tpu.memory_space<vmem>>, vector<1x8x16xf32>
    %49 = vector.shape_cast %48 : vector<1x8x16xf32> to vector<8x16xf32>
    %50 = vector.shape_cast %47 : vector<8x16xf32> to vector<1x8x16xf32>
    tpu.vector_store %arg4[%c0_25, %c0_26, %c144], %50 {strides = array<i32>} : memref<1x8x256xf32, #tpu.memory_space<vmem>>, vector<1x8x16xf32>,
    %51 = vector.extract_strided_slice %10 {offsets = [0, 180], sizes = [8, 16], strides = [1, 1]} : vector<8x288xf32> to vector<8x16xf32>
    %c0_27 = arith.constant 0 : index
    %c0_28 = arith.constant 0 : index
    %c160 = arith.constant 160 : index
    %52 = vector.load %arg4[%c0_27, %c0_28, %c160] : memref<1x8x256xf32, #tpu.memory_space<vmem>>, vector<1x8x16xf32>
    %53 = vector.shape_cast %52 : vector<1x8x16xf32> to vector<8x16xf32>
    %54 = vector.shape_cast %51 : vector<8x16xf32> to vector<1x8x16xf32>
    tpu.vector_store %arg4[%c0_27, %c0_28, %c160], %54 {strides = array<i32>} : memref<1x8x256xf32, #tpu.memory_space<vmem>>, vector<1x8x16xf32>,
    %55 = vector.extract_strided_slice %10 {offsets = [0, 198], sizes = [8, 16], strides = [1, 1]} : vector<8x288xf32> to vector<8x16xf32>
    %c0_29 = arith.constant 0 : index
    %c0_30 = arith.constant 0 : index
    %c176 = arith.constant 176 : index
    %56 = vector.load %arg4[%c0_29, %c0_30, %c176] : memref<1x8x256xf32, #tpu.memory_space<vmem>>, vector<1x8x16xf32>
    %57 = vector.shape_cast %56 : vector<1x8x16xf32> to vector<8x16xf32>
    %58 = vector.shape_cast %55 : vector<8x16xf32> to vector<1x8x16xf32>
    tpu.vector_store %arg4[%c0_29, %c0_30, %c176], %58 {strides = array<i32>} : memref<1x8x256xf32, #tpu.memory_space<vmem>>, vector<1x8x16xf32>,
    %59 = vector.extract_strided_slice %10 {offsets = [0, 216], sizes = [8, 16], strides = [1, 1]} : vector<8x288xf32> to vector<8x16xf32>
    %c0_31 = arith.constant 0 : index
    %c0_32 = arith.constant 0 : index
    %c192 = arith.constant 192 : index
    %60 = vector.load %arg4[%c0_31, %c0_32, %c192] : memref<1x8x256xf32, #tpu.memory_space<vmem>>, vector<1x8x16xf32>
    %61 = vector.shape_cast %60 : vector<1x8x16xf32> to vector<8x16xf32>
    %62 = vector.shape_cast %59 : vector<8x16xf32> to vector<1x8x16xf32>
    tpu.vector_store %arg4[%c0_31, %c0_32, %c192], %62 {strides = array<i32>} : memref<1x8x256xf32, #tpu.memory_space<vmem>>, vector<1x8x16xf32>,
    %63 = vector.extract_strided_slice %10 {offsets = [0, 234], sizes = [8, 16], strides = [1, 1]} : vector<8x288xf32> to vector<8x16xf32>
    %c0_33 = arith.constant 0 : index
    %c0_34 = arith.constant 0 : index
    %c208 = arith.constant 208 : index
    %64 = vector.load %arg4[%c0_33, %c0_34, %c208] : memref<1x8x256xf32, #tpu.memory_space<vmem>>, vector<1x8x16xf32>
    %65 = vector.shape_cast %64 : vector<1x8x16xf32> to vector<8x16xf32>
    %66 = vector.shape_cast %63 : vector<8x16xf32> to vector<1x8x16xf32>
    tpu.vector_store %arg4[%c0_33, %c0_34, %c208], %66 {strides = array<i32>} : memref<1x8x256xf32, #tpu.memory_space<vmem>>, vector<1x8x16xf32>,
    %67 = vector.extract_strided_slice %10 {offsets = [0, 252], sizes = [8, 16], strides = [1, 1]} : vector<8x288xf32> to vector<8x16xf32>
    %c0_35 = arith.constant 0 : index
    %c0_36 = arith.constant 0 : index
    %c224 = arith.constant 224 : index
    %68 = vector.load %arg4[%c0_35, %c0_36, %c224] : memref<1x8x256xf32, #tpu.memory_space<vmem>>, vector<1x8x16xf32>
    %69 = vector.shape_cast %68 : vector<1x8x16xf32> to vector<8x16xf32>
    %70 = vector.shape_cast %67 : vector<8x16xf32> to vector<1x8x16xf32>
    tpu.vector_store %arg4[%c0_35, %c0_36, %c224], %70 {strides = array<i32>} : memref<1x8x256xf32, #tpu.memory_space<vmem>>, vector<1x8x16xf32>,
    %71 = vector.extract_strided_slice %10 {offsets = [0, 270], sizes = [8, 16], strides = [1, 1]} : vector<8x288xf32> to vector<8x16xf32>
    %c0_37 = arith.constant 0 : index
    %c0_38 = arith.constant 0 : index
    %c240 = arith.constant 240 : index
    %72 = vector.load %arg4[%c0_37, %c0_38, %c240] : memref<1x8x256xf32, #tpu.memory_space<vmem>>, vector<1x8x16xf32>
    %73 = vector.shape_cast %72 : vector<1x8x16xf32> to vector<8x16xf32>
    %74 = vector.shape_cast %71 : vector<8x16xf32> to vector<1x8x16xf32>
    tpu.vector_store %arg4[%c0_37, %c0_38, %c240], %74 {strides = array<i32>} : memref<1x8x256xf32, #tpu.memory_space<vmem>>, vector<1x8x16xf32>,
    return
  }
  func.func @transform_0(%arg0: i32) -> (i32, i32, i32) {
    %c0_i32 = arith.constant 0 : i32
    %c0_i32_0 = arith.constant 0 : i32
    %c0_i32_1 = arith.constant 0 : i32
    return %arg0, %c0_i32, %c0_i32_0 : i32, i32, i32
  }
  func.func @transform_1(%arg0: i32) -> (i32, i32) {
    %c0_i32 = arith.constant 0 : i32
    %c0_i32_0 = arith.constant 0 : i32
    %c0_i32_1 = arith.constant 0 : i32
    return %c0_i32, %c0_i32_0 : i32, i32
  }
  func.func @transform_2(%arg0: i32) -> (i32, i32) {
    %c0_i32 = arith.constant 0 : i32
    %c0_i32_0 = arith.constant 0 : i32
    %c0_i32_1 = arith.constant 0 : i32
    return %c0_i32, %c0_i32_0 : i32, i32
  }
  func.func @transform_3(%arg0: i32) -> (i32, i32, i32) {
    %c0_i32 = arith.constant 0 : i32
    %c0_i32_0 = arith.constant 0 : i32
    %c0_i32_1 = arith.constant 0 : i32
    return %arg0, %c0_i32, %c0_i32_0 : i32, i32, i32
  }
}

</mosaic_0001>

<bundles_post_ra>
// kernel: double_conv_forward.5
= control target key start
LH: loop header
LB: loop body
LE: loop exit
PB: predicated region body
PF: predicated region fallthrough
CT: control target
= control target key end

     0   :  { %s413_s12 = smov 0   ;;  %s456_s0 = inlined_call_operand.vmem [shape: bf16[2,8,288], index: 0, kind: input, shape index: {}]   ;;  %s457_s1 = inlined_call_operand.vmem [shape: f32[8,1], index: 1, kind: input, shape index: {}]   ;;  %s458_s2 = inlined_call_operand.vmem [shape: f32[8,1], index: 2, kind: input, shape index: {}]   ;;  %s459_s3 = inlined_call_operand.vmem [shape: f32[2,8,256], index: 3, kind: output, shape index: {}]  }
   0x1 LB: > { %s332_s13 = sadd.s32 4294967295, %s375_s12   ;;  %p336_p0 = scmp.ge.s32.totalorder %s375_s12, 1  ;;  %s375_s12 = sphi %s413_s12, %s13_s12  }
   0x2   : > { %p137_p1 = scmp.lt.s32.totalorder %s375_s12, 3 }
   0x4   : > { %p138_p2 = pnand %p336_p0, %p137_p1 }
   0x5   : > { %p161_p3 = scmp.lt.s32.totalorder (!%p138_p2), %s332_s13, 1  ;;  %s378_s26 = smov (!%p138_p2), 110  }
   0x6   : > { %141 = sbr.rel (%p138_p2) target bundleno = 294 (0x126), region = 32  ;;  %s379_s27 = smov (!%p138_p2), 112  }
   0x7   : > { %s380_s28 = smov (!%p138_p2), 108   ;;  %s381_s29 = smov (!%p138_p2), 126  }
   0x8   : > { %s382_s30 = smov (!%p138_p2), 106   ;;  %s383_s4 = smov (!%p138_p2), 124  }
   0x9   : > { %s384_s5 = smov (!%p138_p2), 104   ;;  %s385_s6 = smov (!%p138_p2), 122  }
   0xa   : > { %s386_s7 = smov (!%p138_p2), 102   ;;  %s387_s8 = smov (!%p138_p2), 120  }
   0xb   : > { %v176_v0 = vld [vmem:[%s457_s1] sm:$0xff]  ;;  %v377_v1 = vmov 0   ;;  %s461_s13 = smov (!%p161_p3, %s332_s13), 1  ;;  %vm197_vm0 = vcmask 130048   ;;  %s388_s9 = smov 100   ;;  %vm203_vm1 = vcmask 261248  }
   0xc   : > { %368 = vset.pattern.permute.xlu0 %v377_v1  ;;  %v185_v2 = vld [vmem:[%s458_s2] sm:$0xff]  ;;  %s343_s18 = smul.u32 12, %s461_s13  ;;  %s342_s22 = sshll.u32 %s461_s13, 4  ;;  %vm208_vm2 = vcmask 392448   ;;  %vm213_vm3 = vcmask 523648   ;;  %vm218_vm4 = vcmask 654848  }
   0xd   : > { %179 = vperm.xlu0 %368, %v176_v0   ;;  %s433_s25 = scalar_lea.vmem %s459_s3, %s342_s22  ;;  %s389_s10 = smov 118   ;;  %vm223_vm5 = vcmask 786048   ;;  %vm269_vm6 = vcmask 818176   ;;  %vm228_vm7 = vcmask 917248   ;;  %vm238_vm8 = vcmask 1048448  }
   0xe   : > { %s165_s21 = scalar_lea.vmem %s456_s0, %s343_s18  ;;  %s390_s11 = smov 114   ;;  %vm235_vm9 = vcmask 932864  }
   0xf   : > { %v171_v3 = vld [vmem:[%s165_s21] sm:$0xff]  ;;  %v172_v14 = vld [vmem:[%s165_s21 + $0x8] sm:$0xf]  ;;  %s391_s13 = smov 98   ;;  %s392_s14 = smov 116  }
  0x10   : > { %v173_v4 = vunpack.c.l.bf16 %v171_v3  ;;  %v174_v5 = vunpack.c.h.bf16 %v171_v3  ;;  %v175_v15 = vunpack.c.l.bf16 %v172_v14 }
  0x11   : > { %188 = vperm.xlu0 %368, %v185_v2  }
  0x88   : > { %v180_v6 = vpop.permute.xlu0 %179 }
  0x89   : > { %v182_v7 = vmul.f32 %v180_v6, %v173_v4  ;;  %v183_v8 = vmul.f32 %v180_v6, %v174_v5  ;;  %v184_v16 = vmul.f32 %v180_v6, %v175_v15 }
  0x8c   : > { %v189_v9 = vpop.permute.xlu0 %188 }
  0x8d   : > { %v191_v10 = vadd.f32 %v189_v9, %v182_v7  ;;  %v192_v11 = vadd.f32 %v189_v9, %v183_v8  ;;  %v193_v17 = vadd.f32 %v189_v9, %v184_v16 }
  0x8f   : > { %v194_v12 = vmax.f32 %v191_v10, 0.0  ;;  %v195_v13 = vmax.f32 %v192_v11, 0.0  ;;  %v196_v18 = vmax.f32 %v193_v17, 0.0 }
  0x91   : > { %244 = vrot.lane.b32.xlu0 %v195_v13, %s378_s26  ;;  %240 = vrot.lane.b32.xlu1 %v195_v13, %s379_s27  ;;  %198 = vst.msk [vmem:[%s433_s25] sm:$0xff] %vm197_vm0, %v194_v12 }
  0x95   : > { %248 = vrot.lane.b32.xlu0 %v195_v13, %s380_s28  ;;  %200 = vrot.lane.b32.xlu1 %v194_v12, %s381_s29 }
  0x99   : > { %252 = vrot.lane.b32.xlu0 %v195_v13, %s382_s30  ;;  %205 = vrot.lane.b32.xlu1 %v194_v12, %s383_s4 }
  0x9d   : > { %256 = vrot.lane.b32.xlu0 %v195_v13, %s384_s5  ;;  %210 = vrot.lane.b32.xlu1 %v194_v12, %s385_s6 }
  0xa1   : > { %260 = vrot.lane.b32.xlu0 %v195_v13, %s386_s7  ;;  %215 = vrot.lane.b32.xlu1 %v194_v12, %s387_s8 }
  0xa5   : > { %267 = vrot.lane.b32.xlu0 %v196_v18, %s388_s9  ;;  %220 = vrot.lane.b32.xlu1 %v194_v12, %s389_s10 }
  0xa9   : > { %231 = vrot.lane.b32.xlu0 %v194_v12, %s390_s11  ;;  %265 = vrot.lane.b32.xlu1 %v195_v13, %s388_s9 }
  0xad   : > { %273 = vrot.lane.b32.xlu0 %v196_v18, %s391_s13  ;;  %225 = vrot.lane.b32.xlu1 %v194_v12, %s392_s14 }
  0xb1   : > { %233 = vrot.lane.b32.xlu1 %v195_v13, %s390_s11 }
 0x103   : > { %v245_v19 = vpop.permute.xlu0 %244  ;;  %v241_v20 = vpop.permute.xlu1 %240 }
 0x104   : > { %243 = vst.msk [vmem:[%s433_s25 + $0x8] sm:$0xff] %vm197_vm0, %v241_v20 }
 0x105   : > { %247 = vst.msk [vmem:[%s433_s25 + $0x8] sm:$0xff] %vm203_vm1, %v245_v19 }
 0x107   : > { %v249_v21 = vpop.permute.xlu0 %248  ;;  %v201_v22 = vpop.permute.xlu1 %200 }
 0x108   : > { %251 = vst.msk [vmem:[%s433_s25 + $0x8] sm:$0xff] %vm208_vm2, %v249_v21 }
 0x109   : > { %204 = vst.msk [vmem:[%s433_s25] sm:$0xff] %vm203_vm1, %v201_v22 }
 0x10b   : > { %v253_v23 = vpop.permute.xlu0 %252  ;;  %v206_v24 = vpop.permute.xlu1 %205 }
 0x10c   : > { %255 = vst.msk [vmem:[%s433_s25 + $0x8] sm:$0xff] %vm213_vm3, %v253_v23 }
 0x10d   : > { %209 = vst.msk [vmem:[%s433_s25] sm:$0xff] %vm208_vm2, %v206_v24 }
 0x10f   : > { %v257_v25 = vpop.permute.xlu0 %256  ;;  %v211_v26 = vpop.permute.xlu1 %210 }
 0x110   : > { %259 = vst.msk [vmem:[%s433_s25 + $0x8] sm:$0xff] %vm218_vm4, %v257_v25 }
 0x111   : > { %214 = vst.msk [vmem:[%s433_s25] sm:$0xff] %vm213_vm3, %v211_v26 }
 0x113   : > { %v261_v27 = vpop.permute.xlu0 %260  ;;  %v216_v28 = vpop.permute.xlu1 %215 }
 0x114   : > { %263 = vst.msk [vmem:[%s433_s25 + $0x8] sm:$0xff] %vm223_vm5, %v261_v27 }
 0x115   : > { %219 = vst.msk [vmem:[%s433_s25] sm:$0xff] %vm218_vm4, %v216_v28 }
 0x117   : > { %v268_v29 = vpop.permute.xlu0 %267  ;;  %v221_v30 = vpop.permute.xlu1 %220 }
 0x118   : > { %224 = vst.msk [vmem:[%s433_s25] sm:$0xff] %vm223_vm5, %v221_v30 }
 0x11b   : > { %v232_v31 = vpop.permute.xlu0 %231  ;;  %v266_v32 = vpop.permute.xlu1 %265 }
 0x11c   : > { %v270_v33 = vsel %vm269_vm6, %v266_v32, %v268_v29 }
 0x11d   : > { %272 = vst.msk [vmem:[%s433_s25 + $0x8] sm:$0xff] %vm228_vm7, %v270_v33 }
 0x11f   : > { %v274_v34 = vpop.permute.xlu0 %273  ;;  %v226_v35 = vpop.permute.xlu1 %225 }
 0x120   : > { %276 = vst.msk [vmem:[%s433_s25 + $0x8] sm:$0xff] %vm238_vm8, %v274_v34 }
 0x121   : > { %229 = vst.msk [vmem:[%s433_s25] sm:$0xff] %vm228_vm7, %v226_v35 }
 0x123   : > { %v234_v36 = vpop.permute.xlu1 %233 }
 0x124   : > { %v236_v37 = vsel %vm235_vm9, %v232_v31, %v234_v36 }
 0x125   : > { %239 = vst.msk [vmem:[%s433_s25] sm:$0xff] %vm238_vm8, %v236_v37 }
 0x126 PF: > { %s13_s12 = sadd.s32 1, %s375_s12  }
 0x127   : > { %p10_p4 = scmp.ge.s32.totalorder %s13_s12, 4  }
 0x129   :  { %12 = sbr.rel (!%p10_p4) target bundleno = 1 (0x1), region = 62 }

// kernel: double_conv_forward.3
= control target key start
LH: loop header
LB: loop body
LE: loop exit
PB: predicated region body
PF: predicated region fallthrough
CT: control target
= control target key end

     0   :  { %s1656_s15 = smov 0   ;;  %s1844_s0 = inlined_call_operand.vmem [shape: bf16[2,4,342], index: 0, kind: input, shape index: {}]   ;;  %s1845_s1 = inlined_call_operand.vmem [shape: bf16[9,8,4], index: 1, kind: input, shape index: {}]   ;;  %s1846_s2 = inlined_call_operand.vmem [shape: f32[1,288], index: 2, kind: input, shape index: {}]   ;;  %s1847_s3 = inlined_call_operand.vmem [shape: bf16[2,8,342], index: 3, kind: output, shape index: {0}]   ;;  %s1848_s4 = inlined_call_operand.vmem [shape: f32[2,8,2], index: 4, kind: output, shape index: {1}]  }
   0x1 LB: > { %s1458_s16 = sadd.s32 4294967295, %s1616_s15   ;;  %p1462_p0 = scmp.ge.s32.totalorder %s1616_s15, 1  ;;  %s1616_s15 = sphi %s1656_s15, %s15_s15  }
   0x2   : > { %p165_p1 = scmp.lt.s32.totalorder %s1616_s15, 3 }
   0x4   : > { %p166_p2 = pnand %p1462_p0, %p165_p1 }
   0x5   : > { %p195_p3 = scmp.lt.s32.totalorder (!%p166_p2), %s1458_s16, 1  ;;  %s1622_s21 = smov (!%p166_p2), 127  }
   0x6   : > { %169 = sbr.rel (%p166_p2) target bundleno = 559 (0x22f), region = 32  ;;  %s1623_s22 = smov (!%p166_p2), 126  }
   0x7   : > { %s1624_s23 = smov (!%p166_p2), 110   ;;  %s1625_s24 = smov (!%p166_p2), 109  }
   0x8   : > { %s1626_s25 = smov (!%p166_p2), 108   ;;  %s1627_s26 = smov (!%p166_p2), 92  }
   0x9   : > { %s1628_s27 = smov (!%p166_p2), 91   ;;  %s1629_s28 = smov (!%p166_p2), 90  }
   0xa   : > { %s1630_s29 = smov (!%p166_p2), 19  }
   0xb   : > { %v219_v0 = vlaneseq  ;;  %v1618_v1 = vmov 1983009808   ;;  %v1619_v3 = vmov 0.0   ;;  %s1850_s16 = smov (!%p195_p3, %s1458_s16), 1  ;;  %vm1620_vm0 = vmmov 0  }
   0xc   : > { %v217_v2 = vunpack.c.l.s4 %v1618_v1  ;;  %1525 = vmatprep.subr.bf16.mxu1 %v1619_v3  ;;  %1527 = vmatprep.mubr.msk.bf16.mxu1 %vm1620_vm0, %v1619_v3  ;;  %s1579_s17 = smul.u32 6, %s1850_s16  ;;  %v1621_v6 = vmov 0   ;;  %vm244_vm1 = vcmask 1041408   ;;  %vm237_vm2 = vcmask 1039360   ;;  %v1466_v52 = vld [vmem:[%s1845_s1 + $0x4] sm:$0xf] }
   0xd   : > { %v1667_v4 = vshrl.u32 %v219_v0, 7  ;;  %286 = vmatprep.mubr.bf16.mxu0 %v1621_v6  ;;  %vm240_vm3 = vcmask 31744   ;;  %vm454_vm4 = vcmask 1031168   ;;  %v211_v62 = vld [vmem:[%s1845_s1] sm:$0xf]  ;;  %vm579_vm5 = vcmask 900096  }
   0xe   : > { %v218_v5 = vunpack.c.0.s8 %v217_v2  ;;  %s1679_s20 = scalar_lea.vmem %s1844_s0, %s1579_s17  ;;  %vm704_vm6 = vcmask 891904   ;;  %vm829_vm7 = vcmask 883712   ;;  %vm954_vm8 = vcmask 752640   ;;  %s1465_s30 = sshll.u32 %s1850_s16, 3 }
   0xf   : > { %v210_v8 = vld [vmem:[%s1679_s20] sm:$0x3f]  ;;  %vm1079_vm9 = vcmask 744448   ;;  %vm1204_vm10 = vcmask 736256   ;;  %vm1324_vm11 = vcmask 261120   ;;  %vm1341_vm12 = vcmask 150528   ;;  %s208_s7 = scalar_lea.vmem %s1848_s4, %s1465_s30 }
  0x10   : > { %v1674_v7 = vsub.s32 %v218_v5, %v1667_v4  ;;  %v215_v10 = vcombine.high %v210_v8, %v210_v8  ;;  %v428_v11 = vld [vmem:[%s1679_s20] sm:$0x3f]  ;;  %vm1329_vm13 = vcmask 7168   ;;  %vm1339_vm14 = vcmask 15368  }
  0x11   : > { %v432_v15 = vcombine.high %v428_v11, %v428_v11  ;;  %v553_v17 = vld [vmem:[%s1679_s20] sm:$0x3f]  ;;  %vm1364_vm15 = vcmask 1043608  }
  0x12   : > { %v1683_v9 = vrot.slane %v210_v8, %v1674_v7  ;;  %v1688_v12 = vrot.slane %v215_v10, %v1674_v7  ;;  %v439_v14 = vrot.slane %v428_v11, %v1674_v7  ;;  %v564_v19 = vrot.slane %v553_v17, %v1674_v7  ;;  %v678_v22 = vld [vmem:[%s1679_s20] sm:$0x3f]  ;;  %v1473_v10 = vld [vmem:[%s1845_s1 + $0x8] sm:$0xf] }
  0x13   : > { %v446_v18 = vrot.slane %v432_v15, %v1674_v7  ;;  %v557_v20 = vcombine.high %v553_v17, %v553_v17  ;;  %v689_v24 = vrot.slane %v678_v22, %v1674_v7  ;;  %v682_v25 = vcombine.high %v678_v22, %v678_v22  ;;  %v803_v27 = vld [vmem:[%s1679_s20] sm:$0x3f] }
  0x14   : > { %231 = vrot.lane.b32.xlu0 %v1683_v9, %s1622_s21  ;;  %v1692_v13 = vcombine.high %v1683_v9, %v1683_v9  ;;  %235 = vrot.lane.b32.xlu1 %v1688_v12, %s1622_s21  ;;  %v447_v16 = vcombine.high %v439_v14, %v439_v14  ;;  %v572_v21 = vcombine.high %v564_v19, %v564_v19  ;;  %v928_v32 = vld [vmem:[%s1679_s20] sm:$0x3f]  ;;  %v345_v55 = vsel %vm244_vm1, %v1688_v12, 0 }
  0x15   : > { %v571_v23 = vrot.slane %v557_v20, %v1674_v7  ;;  %v697_v26 = vcombine.high %v689_v24, %v689_v24  ;;  %v696_v28 = vrot.slane %v682_v25, %v1674_v7  ;;  %v814_v29 = vrot.slane %v803_v27, %v1674_v7  ;;  %v1053_v37 = vld [vmem:[%s1679_s20] sm:$0x3f] }
  0x16   : > { %v807_v30 = vcombine.high %v803_v27, %v803_v27  ;;  %v939_v34 = vrot.slane %v928_v32, %v1674_v7  ;;  %v932_v35 = vcombine.high %v928_v32, %v928_v32  ;;  %v1064_v39 = vrot.slane %v1053_v37, %v1674_v7  ;;  %v1178_v42 = vld [vmem:[%s1679_s20] sm:$0x3f]  ;;  %v1481_v27 = vld [vmem:[%s1845_s1 + $0x10] sm:$0xf] }
  0x17   : > { %v822_v31 = vcombine.high %v814_v29, %v814_v29  ;;  %v1057_v40 = vcombine.high %v1053_v37, %v1053_v37  ;;  %v1189_v44 = vrot.slane %v1178_v42, %v1674_v7  ;;  %v1182_v45 = vcombine.high %v1178_v42, %v1178_v42  ;;  %v1489_v42 = vld [vmem:[%s1845_s1 + $0x18] sm:$0xf] }
  0x18   : > { %233 = vrot.lane.b32.xlu0 %v1692_v13, %s1622_s21  ;;  %448 = vrot.lane.b32.xlu1 %v439_v14, %s1623_s22  ;;  %v821_v33 = vrot.slane %v807_v30, %v1674_v7  ;;  %v947_v36 = vcombine.high %v939_v34, %v939_v34  ;;  %v946_v38 = vrot.slane %v932_v35, %v1674_v7  ;;  %v339_v58 = vsel %vm244_vm1, %v1683_v9, 0  ;;  %v1485_v35 = vld [vmem:[%s1845_s1 + $0x14] sm:$0xf] }
  0x19   : > { %v1072_v41 = vcombine.high %v1064_v39, %v1064_v39  ;;  %v1071_v43 = vrot.slane %v1057_v40, %v1674_v7  ;;  %v1197_v46 = vcombine.high %v1189_v44, %v1189_v44  ;;  %v1196_v47 = vrot.slane %v1182_v45, %v1674_v7 }
  0x1c   : > { %450 = vrot.lane.b32.xlu0 %v447_v16, %s1623_s22  ;;  %452 = vrot.lane.b32.xlu1 %v446_v18, %s1623_s22 }
  0x20   : > { %573 = vrot.lane.b32.xlu0 %v564_v19, %s1624_s23  ;;  %575 = vrot.lane.b32.xlu1 %v572_v21, %s1624_s23  ;;  %v1477_v19 = vld [vmem:[%s1845_s1 + $0xc] sm:$0xf] }
  0x24   : > { %577 = vrot.lane.b32.xlu0 %v571_v23, %s1624_s23  ;;  %698 = vrot.lane.b32.xlu1 %v689_v24, %s1625_s24 }
  0x28   : > { %700 = vrot.lane.b32.xlu0 %v697_v26, %s1625_s24  ;;  %702 = vrot.lane.b32.xlu1 %v696_v28, %s1625_s24 }
  0x2c   : > { %823 = vrot.lane.b32.xlu0 %v814_v29, %s1626_s25  ;;  %825 = vrot.lane.b32.xlu1 %v822_v31, %s1626_s25 }
  0x30   : > { %827 = vrot.lane.b32.xlu0 %v821_v33, %s1626_s25  ;;  %948 = vrot.lane.b32.xlu1 %v939_v34, %s1627_s26  ;;  %s1580_s25 = smul.u32 12, %s1850_s16 }
  0x34   : > { %950 = vrot.lane.b32.xlu0 %v947_v36, %s1627_s26  ;;  %952 = vrot.lane.b32.xlu1 %v946_v38, %s1627_s26 }
  0x38   : > { %1073 = vrot.lane.b32.xlu0 %v1064_v39, %s1628_s27  ;;  %1075 = vrot.lane.b32.xlu1 %v1072_v41, %s1628_s27 }
  0x3c   : > { %1077 = vrot.lane.b32.xlu0 %v1071_v43, %s1628_s27  ;;  %1198 = vrot.lane.b32.xlu1 %v1189_v44, %s1629_s28 }
  0x40   : > { %1200 = vrot.lane.b32.xlu0 %v1197_v46, %s1629_s28  ;;  %1202 = vrot.lane.b32.xlu1 %v1196_v47, %s1629_s28  ;;  %s204_s28 = scalar_lea.vmem %s1847_s3, %s1580_s25 }
  0x41   : > { %1342 = vst.msk [vmem:[%s204_s28] sm:$0xf] %vm1341_vm12, %v1621_v6 }
  0x86   : > { %v232_v48 = vpop.permute.xlu0 %231  ;;  %v236_v49 = vpop.permute.xlu1 %235 }
  0x87   : > { %v252_v50 = vsel %vm244_vm1, %v236_v49, 0 }
  0x88   : > { %1526 = vmatpush3.bf16.msra.mxu1 %v252_v50 }
  0x89   : > { %1531 = vmatprep.subr.bf16.mxu1 %v1619_v3 }
  0x8a   : > { %v234_v51 = vpop.permute.xlu0 %233  ;;  %v449_v57 = vpop.permute.xlu1 %448 }
  0x8b   : > { %v239_v53 = vsel %vm237_vm2, %v234_v51, %v236_v49  ;;  %v238_v54 = vsel %vm237_vm2, %v232_v48, %v234_v51  ;;  %1528 = vmatmul.mubr.msk.bf16.vlgmr.msra.gmra.mxu1 %vm240_vm3, %v1466_v52  ;;  %v1493_v49 = vld [vmem:[%s1845_s1 + $0x1c] sm:$0xf] }
  0x8c   : > { %1467 = vmatprep.subr.msk.bf16.mxu0 %vm244_vm1, %v239_v53  ;;  %v246_v56 = vsel %vm244_vm1, %v238_v54, 0  ;;  %1532 = vmatpush3.bf16.msra.mxu1 %v345_v55  ;;  %v1497_v53 = vld [vmem:[%s1845_s1 + $0x20] sm:$0xf] }
  0x8d   : > { %269 = vmatpush1.bf16.msra.mxu0 %v246_v56  ;;  %1533 = vmatprep.mubr.msk.bf16.mxu1 %vm1620_vm0, %v1619_v3 }
  0x8e   : > { %1470 = vmatprep.subr.msk.bf16.mxu0 %vm244_vm1, %v1692_v13  ;;  %v451_v59 = vpop.permute.xlu0 %450  ;;  %1537 = vmatprep.subr.bf16.mxu1 %v1619_v3  ;;  %v453_v60 = vpop.permute.xlu1 %452 }
  0x8f   : > { %v456_v61 = vsel %vm454_vm4, %v451_v59, %v453_v60  ;;  %v455_v0 = vsel %vm454_vm4, %v449_v57, %v451_v59  ;;  %v467_v1 = vsel %vm244_vm1, %v453_v60, 0  ;;  %vm1370_vm4 = vcmask 699800  }
  0x90   : > { %1468 = vmatmul.mubr.msk.bf16.vlgmr.msra.gmra.mxu0 %vm240_vm3, %v1466_v52  ;;  %v461_v5 = vsel %vm244_vm1, %v455_v0, 0 }
  0x91   : > { %362 = vmatpush1.bf16.msra.mxu0 %v339_v58  ;;  %379 = vmatprep.mubr.bf16.mxu0 %v1621_v6 }
  0x92   : > { %1474 = vmatprep.subr.msk.bf16.mxu0 %vm244_vm1, %v456_v61  ;;  %v574_v63 = vpop.permute.xlu0 %573  ;;  %v576_v2 = vpop.permute.xlu1 %575 }
  0x93   : > { %1534 = vmatmul.mubr.msk.bf16.vlgmr.msra.gmra.mxu1 %vm240_vm3, %v211_v62  ;;  %v580_v12 = vsel %vm579_vm5, %v574_v63, %v576_v2 }
  0x94   : > { %1538 = vmatpush3.bf16.msra.mxu1 %v467_v1  ;;  %1539 = vmatprep.mubr.msk.bf16.mxu1 %vm1620_vm0, %v1619_v3  ;;  %v586_v15 = vsel %vm244_vm1, %v580_v12, 0 }
  0x95   : > { %1543 = vmatprep.subr.bf16.mxu1 %v1619_v3 }
  0x96   : > { %v578_v7 = vpop.permute.xlu0 %577  ;;  %v699_v9 = vpop.permute.xlu1 %698 }
  0x97   : > { %v581_v8 = vsel %vm579_vm5, %v576_v2, %v578_v7  ;;  %v592_v13 = vsel %vm244_vm1, %v578_v7, 0 }
  0x98   : > { %1471 = vmatmul.mubr.msk.bf16.vlgmr.msra.gmra.mxu0 %vm240_vm3, %v211_v62 }
  0x99   : > { %484 = vmatpush1.bf16.msra.mxu0 %v461_v5  ;;  %501 = vmatprep.mubr.bf16.mxu0 %v1621_v6 }
  0x9a   : > { %1478 = vmatprep.subr.msk.bf16.mxu0 %vm244_vm1, %v581_v8  ;;  %v701_v11 = vpop.permute.xlu0 %700  ;;  %v703_v14 = vpop.permute.xlu1 %702 }
  0x9b   : > { %1540 = vmatmul.mubr.msk.bf16.vlgmr.msra.gmra.mxu1 %vm240_vm3, %v1473_v10  ;;  %v706_v17 = vsel %vm704_vm6, %v701_v11, %v703_v14  ;;  %v705_v20 = vsel %vm704_vm6, %v699_v9, %v701_v11  ;;  %v717_v21 = vsel %vm244_vm1, %v703_v14, 0 }
  0x9c   : > { %1544 = vmatpush3.bf16.msra.mxu1 %v592_v13  ;;  %1545 = vmatprep.mubr.msk.bf16.mxu1 %vm1620_vm0, %v1619_v3  ;;  %v711_v23 = vsel %vm244_vm1, %v705_v20, 0 }
  0x9d   : > { %1549 = vmatprep.subr.bf16.mxu1 %v1619_v3 }
  0x9e   : > { %v824_v16 = vpop.permute.xlu0 %823  ;;  %v826_v18 = vpop.permute.xlu1 %825 }
  0x9f   : > { %v830_v28 = vsel %vm829_vm7, %v824_v16, %v826_v18 }
  0xa0   : > { %1475 = vmatmul.mubr.msk.bf16.vlgmr.msra.gmra.mxu0 %vm240_vm3, %v1473_v10  ;;  %v836_v31 = vsel %vm244_vm1, %v830_v28, 0 }
  0xa1   : > { %609 = vmatpush1.bf16.msra.mxu0 %v586_v15  ;;  %626 = vmatprep.mubr.bf16.mxu0 %v1621_v6 }
  0xa2   : > { %1482 = vmatprep.subr.msk.bf16.mxu0 %vm244_vm1, %v706_v17  ;;  %v828_v22 = vpop.permute.xlu0 %827  ;;  %v949_v24 = vpop.permute.xlu1 %948 }
  0xa3   : > { %1546 = vmatmul.mubr.msk.bf16.vlgmr.msra.gmra.mxu1 %vm240_vm3, %v1477_v19  ;;  %v831_v25 = vsel %vm829_vm7, %v826_v18, %v828_v22  ;;  %v842_v29 = vsel %vm244_vm1, %v828_v22, 0 }
  0xa4   : > { %1550 = vmatpush3.bf16.msra.mxu1 %v717_v21  ;;  %1551 = vmatprep.mubr.msk.bf16.mxu1 %vm1620_vm0, %v1619_v3 }
  0xa5   : > { %1555 = vmatprep.subr.bf16.mxu1 %v1619_v3 }
  0xa6   : > { %v951_v26 = vpop.permute.xlu0 %950  ;;  %v953_v30 = vpop.permute.xlu1 %952 }
  0xa7   : > { %v956_v33 = vsel %vm954_vm8, %v951_v26, %v953_v30  ;;  %v955_v36 = vsel %vm954_vm8, %v949_v24, %v951_v26  ;;  %v967_v37 = vsel %vm244_vm1, %v953_v30, 0 }
  0xa8   : > { %1479 = vmatmul.mubr.msk.bf16.vlgmr.msra.gmra.mxu0 %vm240_vm3, %v1477_v19  ;;  %v961_v39 = vsel %vm244_vm1, %v955_v36, 0 }
  0xa9   : > { %734 = vmatpush1.bf16.msra.mxu0 %v711_v23  ;;  %751 = vmatprep.mubr.bf16.mxu0 %v1621_v6 }
  0xaa   : > { %1486 = vmatprep.subr.msk.bf16.mxu0 %vm244_vm1, %v831_v25  ;;  %v1074_v32 = vpop.permute.xlu0 %1073  ;;  %v1076_v34 = vpop.permute.xlu1 %1075 }
  0xab   : > { %1552 = vmatmul.mubr.msk.bf16.vlgmr.msra.gmra.mxu1 %vm240_vm3, %v1481_v27  ;;  %v1080_v43 = vsel %vm1079_vm9, %v1074_v32, %v1076_v34 }
  0xac   : > { %1556 = vmatpush3.bf16.msra.mxu1 %v842_v29  ;;  %1557 = vmatprep.mubr.msk.bf16.mxu1 %vm1620_vm0, %v1619_v3  ;;  %v1086_v47 = vsel %vm244_vm1, %v1080_v43, 0 }
  0xad   : > { %1561 = vmatprep.subr.bf16.mxu1 %v1619_v3 }
  0xae   : > { %v1078_v38 = vpop.permute.xlu0 %1077  ;;  %v1199_v40 = vpop.permute.xlu1 %1198 }
  0xaf   : > { %v1081_v41 = vsel %vm1079_vm9, %v1076_v34, %v1078_v38  ;;  %v1092_v44 = vsel %vm244_vm1, %v1078_v38, 0 }
  0xb0   : > { %1483 = vmatmul.mubr.msk.bf16.vlgmr.msra.gmra.mxu0 %vm240_vm3, %v1481_v27 }
  0xb1   : > { %859 = vmatpush1.bf16.msra.mxu0 %v836_v31  ;;  %876 = vmatprep.mubr.bf16.mxu0 %v1621_v6 }
  0xb2   : > { %1490 = vmatprep.subr.msk.bf16.mxu0 %vm244_vm1, %v956_v33  ;;  %v1201_v45 = vpop.permute.xlu0 %1200  ;;  %v1203_v46 = vpop.permute.xlu1 %1202 }
  0xb3   : > { %1558 = vmatmul.mubr.msk.bf16.vlgmr.msra.gmra.mxu1 %vm240_vm3, %v1485_v35  ;;  %v1206_v48 = vsel %vm1204_vm10, %v1201_v45, %v1203_v46  ;;  %v1205_v50 = vsel %vm1204_vm10, %v1199_v40, %v1201_v45  ;;  %v1217_v51 = vsel %vm244_vm1, %v1203_v46, 0 }
  0xb4   : > { %1562 = vmatpush3.bf16.msra.mxu1 %v967_v37  ;;  %1563 = vmatprep.mubr.msk.bf16.mxu1 %vm1620_vm0, %v1619_v3  ;;  %v1211_v52 = vsel %vm244_vm1, %v1205_v50, 0 }
  0xb5   : > { %1567 = vmatprep.subr.bf16.mxu1 %v1619_v3 }
  0xb8   : > { %1487 = vmatmul.mubr.msk.bf16.vlgmr.msra.gmra.mxu0 %vm240_vm3, %v1485_v35 }
  0xb9   : > { %984 = vmatpush1.bf16.msra.mxu0 %v961_v39  ;;  %1001 = vmatprep.mubr.bf16.mxu0 %v1621_v6 }
  0xba   : > { %1494 = vmatprep.subr.msk.bf16.mxu0 %vm244_vm1, %v1081_v41 }
  0xbb   : > { %1564 = vmatmul.mubr.msk.bf16.vlgmr.msra.gmra.mxu1 %vm240_vm3, %v1489_v42 }
  0xbc   : > { %1568 = vmatpush3.bf16.msra.mxu1 %v1092_v44  ;;  %1569 = vmatprep.mubr.msk.bf16.mxu1 %vm1620_vm0, %v1619_v3 }
  0xbd   : > { %1573 = vmatprep.subr.bf16.mxu1 %v1619_v3 }
  0xc0   : > { %1491 = vmatmul.mubr.msk.bf16.vlgmr.msra.gmra.mxu0 %vm240_vm3, %v1489_v42 }
  0xc1   : > { %1109 = vmatpush1.bf16.msra.mxu0 %v1086_v47  ;;  %1126 = vmatprep.mubr.bf16.mxu0 %v1621_v6 }
  0xc2   : > { %1498 = vmatprep.subr.msk.bf16.mxu0 %vm244_vm1, %v1206_v48  ;;  %vm1359_vm1 = vcmask 154624  }
  0xc3   : > { %1570 = vmatmul.mubr.msk.bf16.vlgmr.msra.gmra.mxu1 %vm240_vm3, %v1493_v49 }
  0xc4   : > { %1574 = vmatpush3.bf16.msra.mxu1 %v1217_v51  ;;  %1575 = vmatprep.mubr.msk.bf16.mxu1 %vm1620_vm0, %v1619_v3  ;;  %vm1365_vm0 = vcmask 1047556  }
  0xc5   : > { %vm1366_vm2 = vmor %vm1365_vm0, %vm1364_vm15 }
  0xc8   : > { %1495 = vmatmul.mubr.msk.bf16.vlgmr.msra.gmra.mxu0 %vm240_vm3, %v1493_v49 }
  0xc9   : > { %1234 = vmatpush1.bf16.msra.mxu0 %v1211_v52  ;;  %1251 = vmatprep.mubr.bf16.mxu0 %v1621_v6 }
  0xcb   : > { %1576 = vmatmul.mubr.msk.bf16.vlgmr.msra.gmra.mxu1 %vm240_vm3, %v1497_v53 }
  0xd0   : > { %1499 = vmatmul.mubr.msk.bf16.vlgmr.msra.gmra.mxu0 %vm240_vm3, %v1497_v53  ;;  %vm1368_vm3 = vcmask 412672  }
 0x14b   : > { %v329_v54 = vpop.f32.mrf.mxu1 }
 0x14d   : > { %v1529_v55 = vpop.f32.mrf.mxu1 }
 0x14f   : > { %v332_v57 = vpop.f32.mrf.mxu1 }
 0x150   : > { %v288_v56 = vpop.f32.mrf.mxu0 }
 0x151   : > { %v1530_v59 = vpop.f32.mrf.mxu1 }
 0x152   : > { %v290_v58 = vpop.f32.mrf.mxu0 }
 0x153   : > { %v422_v60 = vpop.f32.mrf.mxu1 }
 0x154   : > { %v292_v3 = vpop.f32.mrf.mxu0  ;;  %v423_v42 = vadd.f32 %v422_v60, %v329_v54 }
 0x155   : > { %v1535_v62 = vpop.f32.mrf.mxu1 }
 0x156   : > { %v293_v61 = vpop.f32.mrf.mxu0 }
 0x157   : > { %v425_v0 = vpop.f32.mrf.mxu1 }
 0x158   : > { %v381_v63 = vpop.f32.mrf.mxu0 }
 0x159   : > { %v1536_v2 = vpop.f32.mrf.mxu1  ;;  %v382_v47 = vadd.f32 %v381_v63, %v288_v56  ;;  %v1315_v56 = vsub.s32 2, %v1667_v4 }
 0x15a   : > { %v383_v1 = vpop.f32.mrf.mxu0 }
 0x15b   : > { %v544_v7 = vpop.f32.mrf.mxu1  ;;  %v384_v51 = vadd.f32 %v383_v1, %v290_v58  ;;  %v1303_v58 = vld [vmem:[%s1846_s2] sm:$0x7]  ;;  %v1307_v1 = vsub.s32 0, %v1667_v4 }
 0x15c   : > { %v385_v5 = vpop.f32.mrf.mxu0  ;;  %v552_v45 = vadd.f32 %v544_v7, %v423_v42 }
 0x15d   : > { %v1541_v9 = vpop.f32.mrf.mxu1 }
 0x15e   : > { %v386_v8 = vpop.f32.mrf.mxu0 }
 0x15f   : > { %v547_v11 = vpop.f32.mrf.mxu1 }
 0x160   : > { %v503_v10 = vpop.f32.mrf.mxu0 }
 0x161   : > { %v1542_v13 = vpop.f32.mrf.mxu1  ;;  %v550_v52 = vadd.f32 %v503_v10, %v382_v47 }
 0x162   : > { %v505_v12 = vpop.f32.mrf.mxu0 }
 0x163   : > { %v669_v15 = vpop.f32.mrf.mxu1  ;;  %v551_v59 = vadd.f32 %v505_v12, %v384_v51 }
 0x164   : > { %v507_v14 = vpop.f32.mrf.mxu0  ;;  %v677_v49 = vadd.f32 %v669_v15, %v552_v45  ;;  %v1311_v15 = vsub.s32 1, %v1667_v4 }
 0x165   : > { %v1547_v17 = vpop.f32.mrf.mxu1 }
 0x166   : > { %v508_v16 = vpop.f32.mrf.mxu0  ;;  %v1316_v17 = vrot.slane %v1303_v58, %v1315_v56 }
 0x167   : > { %v672_v19 = vpop.f32.mrf.mxu1 }
 0x168   : > { %v628_v18 = vpop.f32.mrf.mxu0 }
 0x169   : > { %v1548_v21 = vpop.f32.mrf.mxu1  ;;  %v675_v3 = vadd.f32 %v628_v18, %v550_v52 }
 0x16a   : > { %v630_v20 = vpop.f32.mrf.mxu0  ;;  %v1308_v21 = vrot.slane %v1303_v58, %v1307_v1 }
 0x16b   : > { %v794_v23 = vpop.f32.mrf.mxu1  ;;  %v676_v2 = vadd.f32 %v630_v20, %v551_v59 }
 0x16c   : > { %v632_v22 = vpop.f32.mrf.mxu0  ;;  %v802_v55 = vadd.f32 %v794_v23, %v677_v49 }
 0x16d   : > { %v1553_v25 = vpop.f32.mrf.mxu1 }
 0x16e   : > { %v633_v24 = vpop.f32.mrf.mxu0 }
 0x16f   : > { %v797_v27 = vpop.f32.mrf.mxu1 }
 0x170   : > { %v753_v26 = vpop.f32.mrf.mxu0 }
 0x171   : > { %v1554_v29 = vpop.f32.mrf.mxu1  ;;  %v800_v54 = vadd.f32 %v753_v26, %v675_v3  ;;  %v1312_v26 = vrot.slane %v1303_v58, %v1311_v15 }
 0x172   : > { %v755_v28 = vpop.f32.mrf.mxu0 }
 0x173   : > { %v919_v31 = vpop.f32.mrf.mxu1  ;;  %v801_v63 = vadd.f32 %v755_v28, %v676_v2 }
 0x174   : > { %v757_v30 = vpop.f32.mrf.mxu0  ;;  %v927_v62 = vadd.f32 %v919_v31, %v802_v55 }
 0x175   : > { %v1559_v33 = vpop.f32.mrf.mxu1 }
 0x176   : > { %v758_v32 = vpop.f32.mrf.mxu0 }
 0x177   : > { %v922_v35 = vpop.f32.mrf.mxu1 }
 0x178   : > { %v878_v34 = vpop.f32.mrf.mxu0 }
 0x179   : > { %v1560_v37 = vpop.f32.mrf.mxu1  ;;  %v925_v8 = vadd.f32 %v878_v34, %v800_v54 }
 0x17a   : > { %v880_v36 = vpop.f32.mrf.mxu0 }
 0x17b   : > { %v1044_v39 = vpop.f32.mrf.mxu1  ;;  %v926_v12 = vadd.f32 %v880_v36, %v801_v63 }
 0x17c   : > { %v882_v38 = vpop.f32.mrf.mxu0  ;;  %v1052_v5 = vadd.f32 %v1044_v39, %v927_v62 }
 0x17d   : > { %v1565_v41 = vpop.f32.mrf.mxu1 }
 0x17e   : > { %v883_v40 = vpop.f32.mrf.mxu0 }
 0x17f   : > { %v1047_v44 = vpop.f32.mrf.mxu1 }
 0x180   : > { %v1003_v43 = vpop.f32.mrf.mxu0 }
 0x181   : > { %v1566_v48 = vpop.f32.mrf.mxu1  ;;  %v1050_v13 = vadd.f32 %v1003_v43, %v925_v8 }
 0x182   : > { %v1005_v46 = vpop.f32.mrf.mxu0 }
 0x183   : > { %v1169_v53 = vpop.f32.mrf.mxu1  ;;  %v1051_v19 = vadd.f32 %v1005_v46, %v926_v12 }
 0x184   : > { %v1007_v50 = vpop.f32.mrf.mxu0  ;;  %v1177_v10 = vadd.f32 %v1169_v53, %v1052_v5 }
 0x185   : > { %v1571_v61 = vpop.f32.mrf.mxu1 }
 0x186   : > { %v1008_v57 = vpop.f32.mrf.mxu0 }
 0x187   : > { %v1172_v60 = vpop.f32.mrf.mxu1 }
 0x188   : > { %v1128_v0 = vpop.f32.mrf.mxu0 }
 0x189   : > { %v1572_v9 = vpop.f32.mrf.mxu1  ;;  %v1175_v20 = vadd.f32 %v1128_v0, %v1050_v13 }
 0x18a   : > { %v1130_v7 = vpop.f32.mrf.mxu0 }
 0x18b   : > { %v1294_v14 = vpop.f32.mrf.mxu1  ;;  %v1176_v24 = vadd.f32 %v1130_v7, %v1051_v19 }
 0x18c   : > { %v1132_v11 = vpop.f32.mrf.mxu0  ;;  %v1302_v16 = vadd.f32 %v1294_v14, %v1177_v10 }
 0x18d   : > { %v1577_v22 = vpop.f32.mrf.mxu1 }
 0x18e   : > { %v1133_v18 = vpop.f32.mrf.mxu0  ;;  %v1322_v28 = vmul.f32 %v1316_v17, %v1302_v16 }
 0x18f   : > { %v1297_v27 = vpop.f32.mrf.mxu1 }
 0x190   : > { %v1253_v23 = vpop.f32.mrf.mxu0  ;;  %v1333_v35 = vmul.f32 %v1322_v28, %v1322_v28  ;;  %v1325_v39 = vsel %vm1324_vm11, %v1322_v28, 0.0  ;;  %v1506_v44 = vpack.c.bf16 %v1322_v28, %v1322_v28 }
 0x191   : > { %v1300_v25 = vadd.f32 %v1253_v23, %v1175_v20  ;;  %v1578_v32 = vpop.f32.mrf.mxu1 }
 0x192   : > { %v1255_v29 = vpop.f32.mrf.mxu0  ;;  %v1335_v42 = vsel %vm1324_vm11, %v1333_v35, 0.0 }
 0x193   : > { %v1320_v30 = vmul.f32 %v1308_v21, %v1300_v25  ;;  %v1301_v31 = vadd.f32 %v1255_v29, %v1176_v24 }
 0x194   : > { %v1257_v33 = vpop.f32.mrf.mxu0 }
 0x195   : > { %v1321_v4 = vmul.f32 %v1312_v26, %v1301_v31  ;;  %v1331_v37 = vmul.f32 %v1320_v30, %v1320_v30 }
 0x196   : > { %v1258_v34 = vpop.f32.mrf.mxu0 }
 0x197   : > { %v1323_v36 = vadd.f32 %v1321_v4, %v1320_v30  ;;  %v1332_v38 = vmul.f32 %v1321_v4, %v1321_v4  ;;  %v1505_v45 = vpack.c.bf16 %v1321_v4, %v1320_v30 }
 0x199   : > { %v1326_v40 = vadd.f32 %v1325_v39, %v1323_v36  ;;  %v1334_v41 = vadd.f32 %v1332_v38, %v1331_v37 }
 0x19b   : > { %1327 = vadd.xlane.f32.xlu0 %v1326_v40  ;;  %v1336_v43 = vadd.f32 %v1335_v42, %v1334_v41 }
 0x19d   : > { %1337 = vadd.xlane.f32.xlu1 %v1336_v43 }
 0x1ae   : > { %1356 = vrot.lane.b32.xlu1 %v1506_v44, %s1630_s29 }
 0x1b1   : > { %1354 = vrot.lane.b32.xlu0 %v1505_v45, %s1630_s29 }
 0x224   : > { %v1328_v46 = vpop.xlane.xlu0 %1327 }
 0x225   : > { %1330 = vst.msk [vmem:[%s208_s7] sm:$0xff] %vm1329_vm13, %v1328_v46 }
 0x226   : > { %v1338_v47 = vpop.xlane.xlu1 %1337 }
 0x227   : > { %1340 = vst.msk [vmem:[%s208_s7] sm:$0xff] %vm1339_vm14, %v1338_v47 }
 0x228   : > { %v1355_v48 = vpop.permute.xlu0 %1354 }
 0x229   : > { %v1358_v49 = vrot.slane %v1355_v48, 4 }
 0x22a   : > { %v1357_v50 = vpop.permute.xlu1 %1356 }
 0x22b   : > { %v1360_v51 = vsel %vm1359_vm1, %v1358_v49, %v1355_v48  ;;  %v1361_v52 = vsel %vm1359_vm1, %v1358_v49, %v1357_v50 }
 0x22c   : > { %1367 = vst.msk [vmem:[%s204_s28] sm:$0xff] %vm1366_vm2, %v1360_v51 }
 0x22d   : > { %1369 = vst.msk [vmem:[%s204_s28 + $0x8] sm:$0xf] %vm1368_vm3, %v1361_v52 }
 0x22e   : > { %1371 = vst.msk [vmem:[%s204_s28 + $0x8] sm:$0xf] %vm1370_vm4, %v1621_v6 }
 0x22f PF: > { %s15_s15 = sadd.s32 1, %s1616_s15  }
 0x230   : > { %p12_p4 = scmp.ge.s32.totalorder %s15_s15, 4  }
 0x232   :  { %14 = sbr.rel (!%p12_p4) target bundleno = 1 (0x1), region = 82 }

// kernel: double_conv_forward.4
= control target key start
LH: loop header
LB: loop body
LE: loop exit
PB: predicated region body
PF: predicated region fallthrough
CT: control target
= control target key end

     0   :  { %s1633_s24 = smov 0   ;;  %s1801_s0 = inlined_call_operand.vmem [shape: bf16[2,8,342], index: 0, kind: input, shape index: {}]   ;;  %s1802_s1 = inlined_call_operand.vmem [shape: f32[8,1], index: 1, kind: input, shape index: {}]   ;;  %s1803_s2 = inlined_call_operand.vmem [shape: f32[8,1], index: 2, kind: input, shape index: {}]   ;;  %s1804_s3 = inlined_call_operand.vmem [shape: bf16[9,8,8], index: 3, kind: input, shape index: {}]   ;;  %s1805_s4 = inlined_call_operand.vmem [shape: f32[1,342], index: 4, kind: input, shape index: {}]   ;;  %s1806_s5 = inlined_call_operand.vmem [shape: f32[1,288], index: 5, kind: input, shape index: {}]   ;;  %s1807_s6 = inlined_call_operand.vmem [shape: bf16[2,8,288], index: 6, kind: output, shape index: {0}]   ;;  %s1808_s7 = inlined_call_operand.vmem [shape: f32[2,8,2], index: 7, kind: output, shape index: {1}]  }
   0x1 LB: > { %s1432_s25 = sadd.s32 4294967295, %s1580_s24   ;;  %p1436_p0 = scmp.ge.s32.totalorder %s1580_s24, 1  ;;  %s1580_s24 = sphi %s1633_s24, %s18_s24  }
   0x2   : > { %p240_p1 = scmp.lt.s32.totalorder %s1580_s24, 3 }
   0x4   : > { %p241_p2 = pnand %p1436_p0, %p240_p1 }
   0x5   : > { %p276_p3 = scmp.lt.s32.totalorder (!%p241_p2), %s1432_s25, 1  ;;  %s1585_s13 = smov (!%p241_p2), 127  }
   0x6   : > { %244 = sbr.rel (%p241_p2) target bundleno = 681 (0x2a9), region = 44  ;;  %s1586_s14 = smov (!%p241_p2), 126  }
   0x7   : > { %s1587_s15 = smov (!%p241_p2), 110   ;;  %s1588_s16 = smov (!%p241_p2), 109  }
   0x8   : > { %s1589_s17 = smov (!%p241_p2), 108   ;;  %s1590_s18 = smov (!%p241_p2), 92  }
   0x9   : > { %s1591_s19 = smov (!%p241_p2), 91   ;;  %s1592_s20 = smov (!%p241_p2), 90  }
   0xb   : > { %v296_v0 = vld [vmem:[%s1802_s1] sm:$0xff]  ;;  %v1582_v1 = vmov 0   ;;  %s1810_s25 = smov (!%p276_p3, %s1432_s25), 1  ;;  %v319_v3 = vlaneseq  ;;  %v1583_v12 = vmov 0.0   ;;  %vm1584_vm0 = vmmov 0  }
   0xc   : > { %1573 = vset.pattern.permute.xlu0 %v1582_v1  ;;  %401 = vmatprep.mubr.bf16.mxu0 %v1582_v1  ;;  %v305_v2 = vld [vmem:[%s1803_s2] sm:$0xff]  ;;  %s1553_s30 = smul.u32 12, %s1810_s25  ;;  %vm359_vm1 = vcmask 1043456   ;;  %vm355_vm2 = vcmask 64512   ;;  %vm352_vm3 = vcmask 1039360   ;;  %vm551_vm4 = vcmask 1031168  }
   0xd   : > { %299 = vperm.xlu0 %1573, %v296_v0   ;;  %v1657_v6 = vshrl.u32 %v319_v3, 7  ;;  %1499 = vmatprep.subr.bf16.mxu1 %v1583_v12  ;;  %v317_v13 = vld [vmem:[%s1805_s4] sm:$0x7]  ;;  %v1440_v38 = vld [vmem:[%s1804_s3 + $0x4] sm:$0xf]  ;;  %vm658_vm5 = vcmask 900096  }
   0xe   : > { %s280_s10 = scalar_lea.vmem %s1801_s0, %s1553_s30  ;;  %1501 = vmatprep.mubr.msk.bf16.mxu1 %vm1584_vm0, %v1583_v12  ;;  %v340_v48 = vld [vmem:[%s1804_s3] sm:$0xf]  ;;  %v1447_v57 = vld [vmem:[%s1804_s3 + $0x8] sm:$0xf]  ;;  %vm765_vm6 = vcmask 891904   ;;  %vm872_vm7 = vcmask 883712   ;;  %s285_s23 = scalar_lea.vmem %s1807_s6, %s1553_s30 }
   0xf   : > { %v291_v4 = vld [vmem:[%s280_s10] sm:$0xff]  ;;  %v292_v5 = vld [vmem:[%s280_s10 + $0x8] sm:$0xf]  ;;  %v321_v11 = vsub.s32 0, %v1657_v6  ;;  %v329_v14 = vsub.s32 2, %v1657_v6  ;;  %v325_v18 = vsub.s32 1, %v1657_v6 }
  0x10   : > { %v293_v7 = vunpack.c.l.bf16 %v291_v4  ;;  %v294_v8 = vunpack.c.h.bf16 %v291_v4  ;;  %v295_v9 = vunpack.c.l.bf16 %v292_v5  ;;  %v1451_v3 = vld [vmem:[%s1804_s3 + $0xc] sm:$0xf]  ;;  %vm979_vm8 = vcmask 752640   ;;  %s1439_s30 = sshll.u32 %s1810_s25, 3 }
  0x11   : > { %308 = vperm.xlu0 %1573, %v305_v2   ;;  %v322_v19 = vrot.slane %v317_v13, %v321_v11  ;;  %v330_v21 = vrot.slane %v317_v13, %v329_v14  ;;  %v326_v25 = vrot.slane %v317_v13, %v325_v18  ;;  %v1455_v13 = vld [vmem:[%s1804_s3 + $0x10] sm:$0xf]  ;;  %vm1086_vm9 = vcmask 744448   ;;  %s289_s28 = scalar_lea.vmem %s1808_s7, %s1439_s30 }
  0x12   : > { %vm1193_vm10 = vcmask 736256   ;;  %vm1344_vm11 = vcmask 257024   ;;  %vm1313_vm12 = vcmask 261120   ;;  %vm1318_vm13 = vcmask 7168  }
  0x13   : > { %vm1328_vm14 = vcmask 15368  }
  0x88   : > { %v300_v10 = vpop.permute.xlu0 %299 }
  0x89   : > { %v302_v15 = vmul.f32 %v300_v10, %v293_v7  ;;  %v303_v16 = vmul.f32 %v300_v10, %v294_v8  ;;  %v304_v17 = vmul.f32 %v300_v10, %v295_v9 }
  0x8c   : > { %v309_v20 = vpop.permute.xlu0 %308 }
  0x8d   : > { %v311_v22 = vadd.f32 %v309_v20, %v302_v15  ;;  %v312_v23 = vadd.f32 %v309_v20, %v303_v16  ;;  %v313_v24 = vadd.f32 %v309_v20, %v304_v17 }
  0x8f   : > { %v314_v26 = vmax.f32 %v311_v22, 0.0  ;;  %v315_v27 = vmax.f32 %v312_v23, 0.0  ;;  %v316_v28 = vmax.f32 %v313_v24, 0.0  ;;  %v1459_v22 = vld [vmem:[%s1804_s3 + $0x14] sm:$0xf] }
  0x91   : > { %v334_v29 = vmul.f32 %v322_v19, %v314_v26  ;;  %v336_v30 = vmul.f32 %v330_v21, %v316_v28  ;;  %v335_v31 = vmul.f32 %v326_v25, %v315_v27 }
  0x93   : > { %v337_v32 = vpack.c.bf16 %v334_v29, %v334_v29  ;;  %v339_v33 = vpack.c.bf16 %v336_v30, %v336_v30  ;;  %v338_v34 = vpack.c.bf16 %v335_v31, %v335_v31  ;;  %v1463_v31 = vld [vmem:[%s1804_s3 + $0x18] sm:$0xf] }
  0x95   : > { %350 = vrot.lane.b32.xlu0 %v339_v33, %s1585_s13  ;;  %346 = vrot.lane.b32.xlu1 %v337_v32, %s1585_s13  ;;  %v460_v42 = vsel %vm359_vm1, %v339_v33, 0  ;;  %v454_v47 = vsel %vm359_vm1, %v337_v32, 0 }
  0x99   : > { %547 = vrot.lane.b32.xlu0 %v338_v34, %s1586_s14  ;;  %348 = vrot.lane.b32.xlu1 %v338_v34, %s1585_s13 }
  0x9d   : > { %652 = vrot.lane.b32.xlu0 %v337_v32, %s1587_s15  ;;  %545 = vrot.lane.b32.xlu1 %v337_v32, %s1586_s14 }
  0xa1   : > { %656 = vrot.lane.b32.xlu0 %v339_v33, %s1587_s15  ;;  %549 = vrot.lane.b32.xlu1 %v339_v33, %s1586_s14 }
  0xa5   : > { %761 = vrot.lane.b32.xlu0 %v338_v34, %s1588_s16  ;;  %654 = vrot.lane.b32.xlu1 %v338_v34, %s1587_s15 }
  0xa9   : > { %866 = vrot.lane.b32.xlu0 %v337_v32, %s1589_s17  ;;  %759 = vrot.lane.b32.xlu1 %v337_v32, %s1588_s16 }
  0xad   : > { %870 = vrot.lane.b32.xlu0 %v339_v33, %s1589_s17  ;;  %763 = vrot.lane.b32.xlu1 %v339_v33, %s1588_s16 }
  0xb1   : > { %975 = vrot.lane.b32.xlu0 %v338_v34, %s1590_s18  ;;  %868 = vrot.lane.b32.xlu1 %v338_v34, %s1589_s17 }
  0xb5   : > { %1080 = vrot.lane.b32.xlu0 %v337_v32, %s1591_s19  ;;  %973 = vrot.lane.b32.xlu1 %v337_v32, %s1590_s18 }
  0xb9   : > { %1084 = vrot.lane.b32.xlu0 %v339_v33, %s1591_s19  ;;  %977 = vrot.lane.b32.xlu1 %v339_v33, %s1590_s18 }
  0xbd   : > { %1189 = vrot.lane.b32.xlu0 %v338_v34, %s1592_s20  ;;  %1082 = vrot.lane.b32.xlu1 %v338_v34, %s1591_s19 }
  0xc1   : > { %1187 = vrot.lane.b32.xlu1 %v337_v32, %s1592_s20 }
  0xc5   : > { %1191 = vrot.lane.b32.xlu1 %v339_v33, %s1592_s20 }
 0x107   : > { %v351_v35 = vpop.permute.xlu0 %350  ;;  %v347_v36 = vpop.permute.xlu1 %346 }
 0x108   : > { %v367_v37 = vsel %vm359_vm1, %v351_v35, 0 }
 0x109   : > { %1500 = vmatpush3.bf16.msra.mxu1 %v367_v37 }
 0x10a   : > { %1505 = vmatprep.subr.bf16.mxu1 %v1583_v12 }
 0x10b   : > { %v548_v39 = vpop.permute.xlu0 %547  ;;  %v349_v40 = vpop.permute.xlu1 %348 }
 0x10c   : > { %1502 = vmatmul.mubr.msk.bf16.vlgmr.msra.gmra.mxu1 %vm355_vm2, %v1440_v38  ;;  %v354_v41 = vsel %vm352_vm3, %v349_v40, %v351_v35  ;;  %v353_v43 = vsel %vm352_vm3, %v347_v36, %v349_v40 }
 0x10d   : > { %1441 = vmatprep.subr.msk.bf16.mxu0 %vm359_vm1, %v354_v41  ;;  %1506 = vmatpush3.bf16.msra.mxu1 %v460_v42  ;;  %v361_v44 = vsel %vm359_vm1, %v353_v43, 0  ;;  %v1471_v43 = vld [vmem:[%s1804_s3 + $0x20] sm:$0xf] }
 0x10e   : > { %384 = vmatpush1.bf16.msra.mxu0 %v361_v44  ;;  %1507 = vmatprep.mubr.msk.bf16.mxu1 %vm1584_vm0, %v1583_v12 }
 0x10f   : > { %v653_v45 = vpop.permute.xlu0 %652  ;;  %1444 = vmatprep.subr.msk.bf16.mxu0 %vm359_vm1, %v338_v34  ;;  %v546_v46 = vpop.permute.xlu1 %545  ;;  %1511 = vmatprep.subr.bf16.mxu1 %v1583_v12 }
 0x110   : > { %v552_v53 = vsel %vm551_vm4, %v546_v46, %v548_v39 }
 0x111   : > { %1442 = vmatmul.mubr.msk.bf16.vlgmr.msra.gmra.mxu0 %vm355_vm2, %v1440_v38  ;;  %v558_v56 = vsel %vm359_vm1, %v552_v53, 0  ;;  %v1467_v38 = vld [vmem:[%s1804_s3 + $0x1c] sm:$0xf] }
 0x112   : > { %477 = vmatpush1.bf16.msra.mxu0 %v454_v47  ;;  %494 = vmatprep.mubr.bf16.mxu0 %v1582_v1 }
 0x113   : > { %v550_v49 = vpop.permute.xlu1 %549  ;;  %v657_v52 = vpop.permute.xlu0 %656 }
 0x114   : > { %v553_v50 = vsel %vm551_vm4, %v548_v39, %v550_v49  ;;  %v564_v51 = vsel %vm359_vm1, %v550_v49, 0  ;;  %1508 = vmatmul.mubr.msk.bf16.vlgmr.msra.gmra.mxu1 %vm355_vm2, %v340_v48  ;;  %v671_v60 = vsel %vm359_vm1, %v657_v52, 0 }
 0x115   : > { %1448 = vmatprep.subr.msk.bf16.mxu0 %vm359_vm1, %v553_v50  ;;  %1512 = vmatpush3.bf16.msra.mxu1 %v564_v51 }
 0x116   : > { %1513 = vmatprep.mubr.msk.bf16.mxu1 %vm1584_vm0, %v1583_v12  ;;  %1517 = vmatprep.subr.bf16.mxu1 %v1583_v12 }
 0x117   : > { %v655_v54 = vpop.permute.xlu1 %654  ;;  %v762_v58 = vpop.permute.xlu0 %761 }
 0x118   : > { %v660_v55 = vsel %vm658_vm5, %v655_v54, %v657_v52  ;;  %v659_v61 = vsel %vm658_vm5, %v653_v45, %v655_v54 }
 0x119   : > { %1445 = vmatmul.mubr.msk.bf16.vlgmr.msra.gmra.mxu0 %vm355_vm2, %v340_v48  ;;  %v665_v0 = vsel %vm359_vm1, %v659_v61, 0 }
 0x11a   : > { %581 = vmatpush1.bf16.msra.mxu0 %v558_v56  ;;  %598 = vmatprep.mubr.bf16.mxu0 %v1582_v1 }
 0x11b   : > { %1452 = vmatprep.subr.msk.bf16.mxu0 %vm359_vm1, %v660_v55  ;;  %v760_v59 = vpop.permute.xlu1 %759  ;;  %v867_v2 = vpop.permute.xlu0 %866 }
 0x11c   : > { %1514 = vmatmul.mubr.msk.bf16.vlgmr.msra.gmra.mxu1 %vm355_vm2, %v1447_v57  ;;  %v766_v7 = vsel %vm765_vm6, %v760_v59, %v762_v58 }
 0x11d   : > { %1518 = vmatpush3.bf16.msra.mxu1 %v671_v60  ;;  %1519 = vmatprep.mubr.msk.bf16.mxu1 %vm1584_vm0, %v1583_v12  ;;  %v772_v10 = vsel %vm359_vm1, %v766_v7, 0 }
 0x11e   : > { %1523 = vmatprep.subr.bf16.mxu1 %v1583_v12 }
 0x11f   : > { %v764_v62 = vpop.permute.xlu1 %763  ;;  %v871_v8 = vpop.permute.xlu0 %870 }
 0x120   : > { %v767_v63 = vsel %vm765_vm6, %v762_v58, %v764_v62  ;;  %v778_v5 = vsel %vm359_vm1, %v764_v62, 0  ;;  %v885_v16 = vsel %vm359_vm1, %v871_v8, 0 }
 0x121   : > { %1449 = vmatmul.mubr.msk.bf16.vlgmr.msra.gmra.mxu0 %vm355_vm2, %v1447_v57 }
 0x122   : > { %688 = vmatpush1.bf16.msra.mxu0 %v665_v0  ;;  %705 = vmatprep.mubr.bf16.mxu0 %v1582_v1 }
 0x123   : > { %1456 = vmatprep.subr.msk.bf16.mxu0 %vm359_vm1, %v767_v63  ;;  %v869_v4 = vpop.permute.xlu1 %868  ;;  %v976_v17 = vpop.permute.xlu0 %975 }
 0x124   : > { %1520 = vmatmul.mubr.msk.bf16.vlgmr.msra.gmra.mxu1 %vm355_vm2, %v1451_v3  ;;  %v874_v15 = vsel %vm872_vm7, %v869_v4, %v871_v8  ;;  %v873_v20 = vsel %vm872_vm7, %v867_v2, %v869_v4 }
 0x125   : > { %1524 = vmatpush3.bf16.msra.mxu1 %v778_v5  ;;  %1525 = vmatprep.mubr.msk.bf16.mxu1 %vm1584_vm0, %v1583_v12  ;;  %v879_v21 = vsel %vm359_vm1, %v873_v20, 0 }
 0x126   : > { %1529 = vmatprep.subr.bf16.mxu1 %v1583_v12 }
 0x127   : > { %v974_v9 = vpop.permute.xlu1 %973  ;;  %v1081_v24 = vpop.permute.xlu0 %1080 }
 0x128   : > { %v980_v27 = vsel %vm979_vm8, %v974_v9, %v976_v17 }
 0x129   : > { %1453 = vmatmul.mubr.msk.bf16.vlgmr.msra.gmra.mxu0 %vm355_vm2, %v1451_v3  ;;  %v986_v28 = vsel %vm359_vm1, %v980_v27, 0 }
 0x12a   : > { %795 = vmatpush1.bf16.msra.mxu0 %v772_v10  ;;  %812 = vmatprep.mubr.bf16.mxu0 %v1582_v1 }
 0x12b   : > { %1460 = vmatprep.subr.msk.bf16.mxu0 %vm359_vm1, %v874_v15  ;;  %v978_v19 = vpop.permute.xlu1 %977  ;;  %v1085_v29 = vpop.permute.xlu0 %1084 }
 0x12c   : > { %1526 = vmatmul.mubr.msk.bf16.vlgmr.msra.gmra.mxu1 %vm355_vm2, %v1455_v13  ;;  %v981_v23 = vsel %vm979_vm8, %v976_v17, %v978_v19  ;;  %v992_v26 = vsel %vm359_vm1, %v978_v19, 0  ;;  %v1099_v33 = vsel %vm359_vm1, %v1085_v29, 0 }
 0x12d   : > { %1530 = vmatpush3.bf16.msra.mxu1 %v885_v16  ;;  %1531 = vmatprep.mubr.msk.bf16.mxu1 %vm1584_vm0, %v1583_v12 }
 0x12e   : > { %1535 = vmatprep.subr.bf16.mxu1 %v1583_v12 }
 0x12f   : > { %v1083_v25 = vpop.permute.xlu1 %1082  ;;  %v1190_v36 = vpop.permute.xlu0 %1189 }
 0x130   : > { %v1088_v32 = vsel %vm1086_vm9, %v1083_v25, %v1085_v29  ;;  %v1087_v34 = vsel %vm1086_vm9, %v1081_v24, %v1083_v25 }
 0x131   : > { %1457 = vmatmul.mubr.msk.bf16.vlgmr.msra.gmra.mxu0 %vm355_vm2, %v1455_v13  ;;  %v1093_v37 = vsel %vm359_vm1, %v1087_v34, 0 }
 0x132   : > { %902 = vmatpush1.bf16.msra.mxu0 %v879_v21  ;;  %919 = vmatprep.mubr.bf16.mxu0 %v1582_v1 }
 0x133   : > { %1464 = vmatprep.subr.msk.bf16.mxu0 %vm359_vm1, %v981_v23  ;;  %v1188_v30 = vpop.permute.xlu1 %1187 }
 0x134   : > { %1532 = vmatmul.mubr.msk.bf16.vlgmr.msra.gmra.mxu1 %vm355_vm2, %v1459_v22  ;;  %v1194_v41 = vsel %vm1193_vm10, %v1188_v30, %v1190_v36 }
 0x135   : > { %1536 = vmatpush3.bf16.msra.mxu1 %v992_v26  ;;  %1537 = vmatprep.mubr.msk.bf16.mxu1 %vm1584_vm0, %v1583_v12  ;;  %v1200_v42 = vsel %vm359_vm1, %v1194_v41, 0 }
 0x136   : > { %1541 = vmatprep.subr.bf16.mxu1 %v1583_v12 }
 0x137   : > { %v1192_v35 = vpop.permute.xlu1 %1191 }
 0x138   : > { %v1195_v39 = vsel %vm1193_vm10, %v1190_v36, %v1192_v35  ;;  %v1206_v40 = vsel %vm359_vm1, %v1192_v35, 0 }
 0x139   : > { %1461 = vmatmul.mubr.msk.bf16.vlgmr.msra.gmra.mxu0 %vm355_vm2, %v1459_v22 }
 0x13a   : > { %1009 = vmatpush1.bf16.msra.mxu0 %v986_v28  ;;  %1026 = vmatprep.mubr.bf16.mxu0 %v1582_v1 }
 0x13b   : > { %1468 = vmatprep.subr.msk.bf16.mxu0 %vm359_vm1, %v1088_v32 }
 0x13c   : > { %1538 = vmatmul.mubr.msk.bf16.vlgmr.msra.gmra.mxu1 %vm355_vm2, %v1463_v31 }
 0x13d   : > { %1542 = vmatpush3.bf16.msra.mxu1 %v1099_v33  ;;  %1543 = vmatprep.mubr.msk.bf16.mxu1 %vm1584_vm0, %v1583_v12 }
 0x13e   : > { %1547 = vmatprep.subr.bf16.mxu1 %v1583_v12 }
 0x141   : > { %1465 = vmatmul.mubr.msk.bf16.vlgmr.msra.gmra.mxu0 %vm355_vm2, %v1463_v31 }
 0x142   : > { %1116 = vmatpush1.bf16.msra.mxu0 %v1093_v37  ;;  %1133 = vmatprep.mubr.bf16.mxu0 %v1582_v1 }
 0x143   : > { %1472 = vmatprep.subr.msk.bf16.mxu0 %vm359_vm1, %v1195_v39 }
 0x144   : > { %1544 = vmatmul.mubr.msk.bf16.vlgmr.msra.gmra.mxu1 %vm355_vm2, %v1467_v38 }
 0x145   : > { %1548 = vmatpush3.bf16.msra.mxu1 %v1206_v40  ;;  %1549 = vmatprep.mubr.msk.bf16.mxu1 %vm1584_vm0, %v1583_v12 }
 0x149   : > { %1469 = vmatmul.mubr.msk.bf16.vlgmr.msra.gmra.mxu0 %vm355_vm2, %v1467_v38 }
 0x14a   : > { %1223 = vmatpush1.bf16.msra.mxu0 %v1200_v42  ;;  %1240 = vmatprep.mubr.bf16.mxu0 %v1582_v1 }
 0x14c   : > { %1550 = vmatmul.mubr.msk.bf16.vlgmr.msra.gmra.mxu1 %vm355_vm2, %v1471_v43 }
 0x151   : > { %1473 = vmatmul.mubr.msk.bf16.vlgmr.msra.gmra.mxu0 %vm355_vm2, %v1471_v43 }
 0x1cc   : > { %v444_v44 = vpop.f32.mrf.mxu1 }
 0x1ce   : > { %v1503_v45 = vpop.f32.mrf.mxu1 }
 0x1d0   : > { %v447_v46 = vpop.f32.mrf.mxu1 }
 0x1d1   : > { %v403_v12 = vpop.f32.mrf.mxu0 }
 0x1d2   : > { %v1504_v47 = vpop.f32.mrf.mxu1 }
 0x1d3   : > { %v405_v48 = vpop.f32.mrf.mxu0 }
 0x1d4   : > { %v537_v49 = vpop.f32.mrf.mxu1 }
 0x1d5   : > { %v407_v50 = vpop.f32.mrf.mxu0  ;;  %v538_v33 = vadd.f32 %v537_v49, %v444_v44  ;;  %v1292_v44 = vld [vmem:[%s1806_s5] sm:$0x7] }
 0x1d6   : > { %v1509_v51 = vpop.f32.mrf.mxu1 }
 0x1d7   : > { %v408_v52 = vpop.f32.mrf.mxu0 }
 0x1d8   : > { %v540_v53 = vpop.f32.mrf.mxu1 }
 0x1d9   : > { %v496_v54 = vpop.f32.mrf.mxu0 }
 0x1da   : > { %v1510_v55 = vpop.f32.mrf.mxu1  ;;  %v497_v41 = vadd.f32 %v496_v54, %v403_v12 }
 0x1db   : > { %v498_v56 = vpop.f32.mrf.mxu0 }
 0x1dc   : > { %v641_v57 = vpop.f32.mrf.mxu1  ;;  %v499_v46 = vadd.f32 %v498_v56, %v405_v48  ;;  %v1305_v48 = vrot.slane %v1292_v44, %v329_v14 }
 0x1dd   : > { %v500_v1 = vpop.f32.mrf.mxu0  ;;  %v649_v36 = vadd.f32 %v641_v57, %v538_v33 }
 0x1de   : > { %v1515_v58 = vpop.f32.mrf.mxu1 }
 0x1df   : > { %v501_v59 = vpop.f32.mrf.mxu0 }
 0x1e0   : > { %v644_v60 = vpop.f32.mrf.mxu1 }
 0x1e1   : > { %v600_v61 = vpop.f32.mrf.mxu0 }
 0x1e2   : > { %v1516_v62 = vpop.f32.mrf.mxu1  ;;  %v647_v47 = vadd.f32 %v600_v61, %v497_v41 }
 0x1e3   : > { %v602_v63 = vpop.f32.mrf.mxu0 }
 0x1e4   : > { %v748_v0 = vpop.f32.mrf.mxu1  ;;  %v648_v53 = vadd.f32 %v602_v63, %v499_v46 }
 0x1e5   : > { %v604_v2 = vpop.f32.mrf.mxu0  ;;  %v756_v39 = vadd.f32 %v748_v0, %v649_v36 }
 0x1e6   : > { %v1521_v3 = vpop.f32.mrf.mxu1 }
 0x1e7   : > { %v605_v4 = vpop.f32.mrf.mxu0 }
 0x1e8   : > { %v751_v5 = vpop.f32.mrf.mxu1 }
 0x1e9   : > { %v707_v7 = vpop.f32.mrf.mxu0 }
 0x1ea   : > { %v1522_v8 = vpop.f32.mrf.mxu1  ;;  %v754_v55 = vadd.f32 %v707_v7, %v647_v47 }
 0x1eb   : > { %v709_v9 = vpop.f32.mrf.mxu0 }
 0x1ec   : > { %v855_v10 = vpop.f32.mrf.mxu1  ;;  %v755_v58 = vadd.f32 %v709_v9, %v648_v53 }
 0x1ed   : > { %v711_v13 = vpop.f32.mrf.mxu0  ;;  %v863_v43 = vadd.f32 %v855_v10, %v756_v39  ;;  %v1297_v10 = vrot.slane %v1292_v44, %v321_v11 }
 0x1ee   : > { %v1527_v15 = vpop.f32.mrf.mxu1 }
 0x1ef   : > { %v712_v16 = vpop.f32.mrf.mxu0 }
 0x1f0   : > { %v858_v17 = vpop.f32.mrf.mxu1 }
 0x1f1   : > { %v814_v19 = vpop.f32.mrf.mxu0 }
 0x1f2   : > { %v1528_v20 = vpop.f32.mrf.mxu1  ;;  %v861_v59 = vadd.f32 %v814_v19, %v754_v55  ;;  %v1301_v19 = vrot.slane %v1292_v44, %v325_v18 }
 0x1f3   : > { %v816_v21 = vpop.f32.mrf.mxu0 }
 0x1f4   : > { %v962_v22 = vpop.f32.mrf.mxu1  ;;  %v862_v56 = vadd.f32 %v816_v21, %v755_v58 }
 0x1f5   : > { %v818_v23 = vpop.f32.mrf.mxu0  ;;  %v970_v51 = vadd.f32 %v962_v22, %v863_v43 }
 0x1f6   : > { %v1533_v24 = vpop.f32.mrf.mxu1 }
 0x1f7   : > { %v819_v25 = vpop.f32.mrf.mxu0 }
 0x1f8   : > { %v965_v26 = vpop.f32.mrf.mxu1 }
 0x1f9   : > { %v921_v27 = vpop.f32.mrf.mxu0 }
 0x1fa   : > { %v1534_v28 = vpop.f32.mrf.mxu1  ;;  %v968_v61 = vadd.f32 %v921_v27, %v861_v59 }
 0x1fb   : > { %v923_v29 = vpop.f32.mrf.mxu0 }
 0x1fc   : > { %v1069_v30 = vpop.f32.mrf.mxu1  ;;  %v969_v2 = vadd.f32 %v923_v29, %v862_v56 }
 0x1fd   : > { %v925_v31 = vpop.f32.mrf.mxu0  ;;  %v1077_v49 = vadd.f32 %v1069_v30, %v970_v51 }
 0x1fe   : > { %v1539_v32 = vpop.f32.mrf.mxu1 }
 0x1ff   : > { %v926_v34 = vpop.f32.mrf.mxu0 }
 0x200   : > { %v1072_v35 = vpop.f32.mrf.mxu1 }
 0x201   : > { %v1028_v37 = vpop.f32.mrf.mxu0 }
 0x202   : > { %v1540_v38 = vpop.f32.mrf.mxu1  ;;  %v1075_v3 = vadd.f32 %v1028_v37, %v968_v61 }
 0x203   : > { %v1030_v40 = vpop.f32.mrf.mxu0 }
 0x204   : > { %v1176_v42 = vpop.f32.mrf.mxu1  ;;  %v1076_v8 = vadd.f32 %v1030_v40, %v969_v2 }
 0x205   : > { %v1032_v45 = vpop.f32.mrf.mxu0  ;;  %v1184_v54 = vadd.f32 %v1176_v42, %v1077_v49 }
 0x206   : > { %v1545_v50 = vpop.f32.mrf.mxu1 }
 0x207   : > { %v1033_v52 = vpop.f32.mrf.mxu0 }
 0x208   : > { %v1179_v1 = vpop.f32.mrf.mxu1 }
 0x209   : > { %v1135_v57 = vpop.f32.mrf.mxu0 }
 0x20a   : > { %v1546_v12 = vpop.f32.mrf.mxu1  ;;  %v1182_v9 = vadd.f32 %v1135_v57, %v1075_v3 }
 0x20b   : > { %v1137_v60 = vpop.f32.mrf.mxu0 }
 0x20c   : > { %v1283_v62 = vpop.f32.mrf.mxu1  ;;  %v1183_v16 = vadd.f32 %v1137_v60, %v1076_v8 }
 0x20d   : > { %v1291_v63 = vadd.f32 %v1283_v62, %v1184_v54  ;;  %v1139_v0 = vpop.f32.mrf.mxu0 }
 0x20e   : > { %v1551_v4 = vpop.f32.mrf.mxu1 }
 0x20f   : > { %v1311_v5 = vmul.f32 %v1305_v48, %v1291_v63  ;;  %v1140_v7 = vpop.f32.mrf.mxu0 }
 0x210   : > { %v1286_v14 = vpop.f32.mrf.mxu1 }
 0x211   : > { %v1480_v13 = vpack.c.bf16 %v1311_v5, %v1311_v5  ;;  %v1242_v15 = vpop.f32.mrf.mxu0  ;;  %v1322_v26 = vmul.f32 %v1311_v5, %v1311_v5  ;;  %v1314_v31 = vsel %vm1313_vm12, %v1311_v5, 0.0 }
 0x212   : > { %v1289_v17 = vadd.f32 %v1242_v15, %v1182_v9  ;;  %v1552_v20 = vpop.f32.mrf.mxu1 }
 0x213   : > { %v1244_v21 = vpop.f32.mrf.mxu0  ;;  %1345 = vst.msk [vmem:[%s285_s23 + $0x8] sm:$0xf] %vm1344_vm11, %v1480_v13  ;;  %v1324_v18 = vsel %vm1313_vm12, %v1322_v26, 0.0 }
 0x214   : > { %v1309_v22 = vmul.f32 %v1297_v10, %v1289_v17  ;;  %v1290_v23 = vadd.f32 %v1244_v21, %v1183_v16 }
 0x215   : > { %v1246_v11 = vpop.f32.mrf.mxu0 }
 0x216   : > { %v1310_v24 = vmul.f32 %v1301_v19, %v1290_v23  ;;  %v1320_v29 = vmul.f32 %v1309_v22, %v1309_v22 }
 0x217   : > { %v1247_v25 = vpop.f32.mrf.mxu0 }
 0x218   : > { %v1479_v27 = vpack.c.bf16 %v1310_v24, %v1309_v22  ;;  %v1312_v28 = vadd.f32 %v1310_v24, %v1309_v22  ;;  %v1321_v30 = vmul.f32 %v1310_v24, %v1310_v24 }
 0x21a   : > { %1343 = vst [vmem:[%s285_s23] sm:$0xff] %v1479_v27  ;;  %v1315_v32 = vadd.f32 %v1314_v31, %v1312_v28  ;;  %v1323_v6 = vadd.f32 %v1321_v30, %v1320_v29 }
 0x21c   : > { %1316 = vadd.xlane.f32.xlu0 %v1315_v32  ;;  %v1325_v33 = vadd.f32 %v1324_v18, %v1323_v6 }
 0x21e   : > { %1326 = vadd.xlane.f32.xlu1 %v1325_v33 }
 0x2a5   : > { %v1317_v34 = vpop.xlane.xlu0 %1316 }
 0x2a6   : > { %1319 = vst.msk [vmem:[%s289_s28] sm:$0xff] %vm1318_vm13, %v1317_v34 }
 0x2a7   : > { %v1327_v35 = vpop.xlane.xlu1 %1326 }
 0x2a8   : > { %1329 = vst.msk [vmem:[%s289_s28] sm:$0xff] %vm1328_vm14, %v1327_v35 }
 0x2a9 PF: > { %s18_s24 = sadd.s32 1, %s1580_s24  }
 0x2aa   : > { %p15_p4 = scmp.ge.s32.totalorder %s18_s24, 4  }
 0x2ac   :  { %17 = sbr.rel (!%p15_p4) target bundleno = 1 (0x1), region = 94 }

</bundles_post_ra>
